<compile_context>
chip_gen: v7x
topology: tpu7x:2x2x1
jax: 0.10.0
libtpu: 0.0.40
codegen_flags: <defaults>
</compile_context>

<pallas_src>
import jax
import jax.numpy as jnp
from jax.experimental import pallas as pl
from jax.experimental.pallas import tpu as pltpu


def _round_up(x, m):
    return ((x + m - 1) // m) * m


# ---------------------------------------------------------------------------
# Kernel
# ---------------------------------------------------------------------------
def _make_kernel(A, R, Rp, RHp):
    """Kernel closed over static sizes. A is small -> static unroll."""

    def kernel(obs_ref, w1_ref, b1_ref, w2_ref, b2_ref,
               ws1_ref, bs1_ref, ws2_ref, bs2_ref, ws3_ref, bs3_ref,
               out_ref):
        obs = obs_ref[...]                                             # (TB, O)

        # --- supervisor trunk (shared across actions) ---
        h1 = jnp.maximum(
            jnp.dot(obs, ws1_ref[...], preferred_element_type=jnp.float32)
            + bs1_ref[...], 0.0)                                       # (TB, S1)
        h2 = jnp.maximum(
            jnp.dot(h1, ws2_ref[...], preferred_element_type=jnp.float32)
            + bs2_ref[...], 0.0)                                       # (TB, S2)

        # --- supervisor logits for ALL actions in one matmul ---
        logits_all = (jnp.dot(h2, ws3_ref[...],
                              preferred_element_type=jnp.float32)
                      + bs3_ref[...])                                  # (TB, A*Rp)

        # --- reflex layer 1 for ALL actions in one matmul ---
        hr_all = jnp.maximum(
            jnp.dot(obs, w1_ref[...], preferred_element_type=jnp.float32)
            + b1_ref[...], 0.0)                                        # (TB, A*RHp)

        # Lane mask over the padded reflex axis (first R of Rp lanes valid).
        lane_ids = jax.lax.broadcasted_iota(jnp.int32, (1, Rp), 1)
        lane_mask = lane_ids < R                                       # (1, Rp)
        neg = jnp.float32(-1e30)

        cols = []
        for a in range(A):  # static unroll over actions (A is tiny)
            # masked softmax over reflexes on a lane-aligned 128-wide slice
            logits = logits_all[:, a * Rp:(a + 1) * Rp]                # (TB, Rp)
            lm = jnp.where(lane_mask, logits, neg)
            m = jnp.max(lm, axis=-1, keepdims=True)
            p = jnp.exp(lm - m)                                        # pad -> 0
            w = p * pl.reciprocal(jnp.sum(p, axis=-1, keepdims=True),
                                  approx=True)                         # (TB, Rp)

            # block-diagonal second reflex layer for action a
            hr = hr_all[:, a * RHp:(a + 1) * RHp]                      # (TB, RHp)
            ro = (jnp.dot(hr, w2_ref[a],
                          preferred_element_type=jnp.float32)
                  + b2_ref[a])                                         # (TB, Rp)

            cols.append(jnp.sum(ro * w, axis=-1, keepdims=True))       # (TB, 1)

        # single dense store of the whole (TB, A) tile
        out_ref[...] = jnp.concatenate(cols, axis=-1)

    return kernel


# ---------------------------------------------------------------------------
# Plain-JAX path over the packed params (used for tiny / single-obs batches)
# ---------------------------------------------------------------------------
def _packed_forward_jax(obs, packed, A, R, Rp, RHp):
    (w1_all, b1_all, w2p, b2p, ws1, bs1, ws2, bs2, ws3_all, bs3_all) = packed
    h1 = jax.nn.relu(obs @ ws1 + bs1)
    h2 = jax.nn.relu(h1 @ ws2 + bs2)
    logits = (h2 @ ws3_all + bs3_all).reshape(-1, A, Rp)[:, :, :R]
    sw = jax.nn.softmax(logits, axis=-1)
    hr = jax.nn.relu(obs @ w1_all + b1_all).reshape(-1, A, RHp)
    ro = jnp.einsum('ban,anr->bar', hr, w2p)[:, :, :R] + b2p[None, :, 0, :R]
    return jnp.sum(ro * sw, axis=-1)


# ---------------------------------------------------------------------------
# Pallas wrapper
# ---------------------------------------------------------------------------
def reflex_policy_forward(obs, packed, *, num_reflexes, tile_b=256):
    """Forward pass. obs: (B, O) or (O,) float32. Returns (B, A) or (A,)."""
    (w1_all, b1_all, w2p, b2p, ws1, bs1, ws2, bs2, ws3_all, bs3_all) = packed
    A, RHp, Rp = w2p.shape
    R = int(num_reflexes)
    O, S1 = ws1.shape
    S2 = ws2.shape[1]

    squeeze = obs.ndim == 1
    if squeeze:
        obs = obs[None, :]
    B = obs.shape[0]

    # Tiny batches are pure launch/DMA overhead for a Pallas kernel -> let
    # XLA fuse the plain-JAX path instead (single-observation inference).
    if B < 8:
        out = _packed_forward_jax(obs, packed, A, R, Rp, RHp)
        return out[0] if squeeze else out

    # Batch tile: big (amortizes ~0.35us/step overhead, gives the MXU real M),
    # multiple of 8 sublanes.  tile_b<=512 keeps the largest live activation
    # (hr_all: TB x A*RHp f32) comfortably inside v7x's smaller 64 MiB VMEM
    # while still being >85%-of-roofline-sized on v5e/v6e.
    tile_b = max(8, (int(tile_b) // 8) * 8)
    TB = min(tile_b, _round_up(B, 8))
    Bp = _round_up(B, TB)
    if Bp != B:  # pad ragged batches; padded rows are sliced off below
        obs = jnp.concatenate([obs, jnp.zeros((Bp - B, O), obs.dtype)], axis=0)

    const = lambda nd: (lambda i: (0,) * nd)  # weights: same block every step

    out = pl.pallas_call(
        _make_kernel(A, R, Rp, RHp),
        out_shape=jax.ShapeDtypeStruct((Bp, A), jnp.float32),
        grid=(Bp // TB,),
        in_specs=[
            pl.BlockSpec((TB, O), lambda i: (i, 0)),        # obs (batch-tiled)
            pl.BlockSpec((O, A * RHp), const(2)),           # fused reflex W1
            pl.BlockSpec((1, A * RHp), const(2)),           # fused reflex b1
            pl.BlockSpec((A, RHp, Rp), const(3)),           # block-diag reflex W2
            pl.BlockSpec((A, 1, Rp), const(3)),             # reflex b2 (padded)
            pl.BlockSpec((O, S1), const(2)),                # supervisor W1
            pl.BlockSpec((1, S1), const(2)),                # supervisor b1
            pl.BlockSpec((S1, S2), const(2)),               # supervisor W2
            pl.BlockSpec((1, S2), const(2)),                # supervisor b2
            pl.BlockSpec((S2, A * Rp), const(2)),           # fused supervisor W3
            pl.BlockSpec((1, A * Rp), const(2)),            # fused supervisor b3
        ],
        out_specs=pl.BlockSpec((TB, A), lambda i: (i, 0)),
        compiler_params=pltpu.CompilerParams(
            dimension_semantics=("parallel",)),             # megacore on v7x
    )(obs, w1_all, b1_all, w2p, b2p, ws1, bs1, ws2, bs2, ws3_all, bs3_all)

    out = out[:B]
    return out[0] if squeeze else out


# ---------------------------------------------------------------------------
# Parameters: natural per-reflex layout + packing into the fused kernel layout
# ---------------------------------------------------------------------------
def init_base_params(key, obs_size, act_size, num_reflexes, ref_hidden,
                     sup_hidden):
    """Synthetic parameters in the natural ReflexPolicy layout."""
    O, A, R, H = obs_size, act_size, num_reflexes, ref_hidden
    S1, S2 = sup_hidden
    ks = jax.random.split(key, 10)
    s = 0.1
    w1 = jax.random.normal(ks[0], (A, R, O, H), jnp.float32) * s   # reflex L1
    b1 = jax.random.normal(ks[1], (A, R, H), jnp.float32) * s
    w2 = jax.random.normal(ks[2], (A, R, H), jnp.float32) * s      # reflex L2
    b2 = jax.random.normal(ks[3], (A, R), jnp.float32) * s
    ws1 = jax.random.normal(ks[4], (O, S1), jnp.float32) * s       # supervisor
    bs1 = jax.random.normal(ks[5], (S1,), jnp.float32) * s
    ws2 = jax.random.normal(ks[6], (S1, S2), jnp.float32) * s
    bs2 = jax.random.normal(ks[7], (S2,), jnp.float32) * s
    ws3 = jax.random.normal(ks[8], (S2, A * R), jnp.float32) * s   # -> (A, R)
    bs3 = jax.random.normal(ks[9], (A * R,), jnp.float32) * s
    return (w1, b1, w2, b2, ws1, bs1, ws2, bs2, ws3, bs3)


def pack_params(base, *, lane=128):
    """Pack/pad parameters into the lane-aligned fused layout the kernel uses."""
    (w1, b1, w2, b2, ws1, bs1, ws2, bs2, ws3, bs3) = base
    A, R, O, H = w1.shape
    RH = R * H
    RHp = _round_up(RH, lane)
    Rp = _round_up(R, lane)
    S1 = ws1.shape[1]
    S2 = ws2.shape[1]

    # Reflex layer 1, fused across actions: column a*RHp + r*H + h.
    w1_o = jnp.transpose(w1, (2, 0, 1, 3)).reshape(O, A, RH)
    w1_all = (jnp.zeros((O, A, RHp), jnp.float32)
              .at[:, :, :RH].set(w1_o).reshape(O, A * RHp))
    b1_all = (jnp.zeros((A, RHp), jnp.float32)
              .at[:, :RH].set(b1.reshape(A, RH)).reshape(1, A * RHp))

    # Reflex layer 2: per-action block-diagonal, padded to (RHp, Rp) so its
    # output lanes line up with the padded softmax slice.
    eye = jnp.eye(R, dtype=jnp.float32)
    w2bd = (w2[:, :, :, None] * eye[None, :, None, :]).reshape(A, RH, R)
    w2p = jnp.zeros((A, RHp, Rp), jnp.float32).at[:, :RH, :R].set(w2bd)
    b2p = jnp.zeros((A, 1, Rp), jnp.float32).at[:, 0, :R].set(b2)

    # Supervisor: last layer fused across actions with R padded to Rp lanes.
    bs1p = bs1.reshape(1, S1)
    bs2p = bs2.reshape(1, S2)
    ws3p = (jnp.zeros((S2, A, Rp), jnp.float32)
            .at[:, :, :R].set(ws3.reshape(S2, A, R)).reshape(S2, A * Rp))
    bs3p = (jnp.zeros((A, Rp), jnp.float32)
            .at[:, :R].set(bs3.reshape(A, R)).reshape(1, A * Rp))

    return (w1_all, b1_all, w2p, b2p, ws1, bs1p, ws2, bs2p, ws3p, bs3p)


# ---------------------------------------------------------------------------
# Pure-JAX reference of ReflexPolicy.forward (natural layout, for checking)
# ---------------------------------------------------------------------------
def reference_forward(obs, base):
    (w1, b1, w2, b2, ws1, bs1, ws2, bs2, ws3, bs3) = base
    A, R, _, _ = w1.shape
    h1 = jax.nn.relu(obs @ ws1 + bs1)
    h2 = jax.nn.relu(h1 @ ws2 + bs2)
    logits = (h2 @ ws3 + bs3).reshape(-1, A, R)          # .view(-1, A, R)
    sw = jax.nn.softmax(logits, axis=-1)
    hr = jax.nn.relu(jnp.einsum('bo,aroh->barh', obs, w1) + b1[None])
    ro = jnp.einsum('barh,arh->bar', hr, w2) + b2[None]  # (B, A, R)
    return jnp.sum(ro * sw, axis=-1)                     # (B, A)


if __name__ == "__main__":
    OBS_SIZE = 8        # observation_space.shape[0]
    ACT_SIZE = 4        # action_space.shape[0]
    NUM_REFLEXES = 25   # default
    REF_HIDDEN = 16     # ref_layers_config=[16]
    SUP_HIDDEN = (32, 32)  # sup_layers_config=[32, 32]
    BATCH = 16

    key = jax.random.PRNGKey(0)
    k_obs, k_par = jax.random.split(key)
    obs = jax.random.normal(k_obs, (BATCH, OBS_SIZE), jnp.float32)
    base = init_base_params(k_par, OBS_SIZE, ACT_SIZE, NUM_REFLEXES,
                            REF_HIDDEN, SUP_HIDDEN)
    packed = pack_params(base)

    out = reflex_policy_forward(obs, packed, num_reflexes=NUM_REFLEXES,
                                tile_b=256)
    out = jax.block_until_ready(out)

    ref = reference_forward(obs, base)
    assert out.shape == (BATCH, ACT_SIZE)
    assert jnp.allclose(out, ref, rtol=1e-3, atol=1e-4), (
        "Pallas output mismatch vs reference")

    # single-observation path (bypasses Pallas, plain XLA)
    out1 = reflex_policy_forward(obs[0], packed, num_reflexes=NUM_REFLEXES)
    out1 = jax.block_until_ready(out1)
    assert out1.shape == (ACT_SIZE,)
    assert jnp.allclose(out1, ref[0], rtol=1e-3, atol=1e-4), (
        "single-obs path mismatch vs reference")

    print("KERNEL_OK")
</pallas_src>

<mosaic_0001>
module attributes {stable_mosaic.version = 11 : i64} {
  func.func @kernel(%arg0: i32, %arg1: memref<16x8xf32, #tpu.memory_space<vmem>>, %arg2: memref<8x2048xf32, #tpu.memory_space<vmem>>, %arg3: memref<1x2048xf32, #tpu.memory_space<vmem>>, %arg4: memref<4x512x128xf32, #tpu.memory_space<vmem>>, %arg5: memref<4x1x128xf32, #tpu.memory_space<vmem>>, %arg6: memref<8x32xf32, #tpu.memory_space<vmem>>, %arg7: memref<1x32xf32, #tpu.memory_space<vmem>>, %arg8: memref<32x32xf32, #tpu.memory_space<vmem>>, %arg9: memref<1x32xf32, #tpu.memory_space<vmem>>, %arg10: memref<32x512xf32, #tpu.memory_space<vmem>>, %arg11: memref<1x512xf32, #tpu.memory_space<vmem>>, %arg12: memref<16x4xf32, #tpu.memory_space<vmem>>) attributes {dimension_semantics = [#tpu.dimension_semantics<parallel>], iteration_bounds = array<i64: 1>, scalar_prefetch = 0 : i64, scratch_operands = 0 : i64, tpu.core_type = #tpu.core_type<tc>, window_params = [{transform_indices = @transform_0, window_bounds = array<i64: 16, 8>}, {pipeline_mode = #tpu.pipeline_mode<synchronous>, transform_indices = @transform_1, window_bounds = array<i64: 8, 2048>}, {pipeline_mode = #tpu.pipeline_mode<synchronous>, transform_indices = @transform_2, window_bounds = array<i64: 1, 2048>}, {pipeline_mode = #tpu.pipeline_mode<synchronous>, transform_indices = @transform_3, window_bounds = array<i64: 4, 512, 128>}, {pipeline_mode = #tpu.pipeline_mode<synchronous>, transform_indices = @transform_4, window_bounds = array<i64: 4, 1, 128>}, {pipeline_mode = #tpu.pipeline_mode<synchronous>, transform_indices = @transform_5, window_bounds = array<i64: 8, 32>}, {pipeline_mode = #tpu.pipeline_mode<synchronous>, transform_indices = @transform_6, window_bounds = array<i64: 1, 32>}, {pipeline_mode = #tpu.pipeline_mode<synchronous>, transform_indices = @transform_7, window_bounds = array<i64: 32, 32>}, {pipeline_mode = #tpu.pipeline_mode<synchronous>, transform_indices = @transform_8, window_bounds = array<i64: 1, 32>}, {pipeline_mode = #tpu.pipeline_mode<synchronous>, transform_indices = @transform_9, window_bounds = array<i64: 32, 512>}, {pipeline_mode = #tpu.pipeline_mode<synchronous>, transform_indices = @transform_10, window_bounds = array<i64: 1, 512>}, {transform_indices = @transform_11, window_bounds = array<i64: 16, 4>}]} {
    %c0 = arith.constant 0 : index
    %c0_0 = arith.constant 0 : index
    %0 = vector.load %arg1[%c0, %c0_0] : memref<16x8xf32, #tpu.memory_space<vmem>>, vector<16x8xf32>
    %c0_1 = arith.constant 0 : index
    %c0_2 = arith.constant 0 : index
    %1 = vector.load %arg6[%c0_1, %c0_2] : memref<8x32xf32, #tpu.memory_space<vmem>>, vector<8x32xf32>
    %cst = arith.constant dense<0.000000e+00> : vector<16x32xf32>
    %2 = tpu.matmul %0, %1, %cst {dimension_numbers = #tpu.dot_dimension_numbers<[1], [0], [0], [1], [0, 0, 1, 1], [], []>} : vector<16x8xf32>, vector<8x32xf32>, vector<16x32xf32> -> vector<16x32xf32>
    %c0_3 = arith.constant 0 : index
    %c0_4 = arith.constant 0 : index
    %3 = vector.load %arg7[%c0_3, %c0_4] : memref<1x32xf32, #tpu.memory_space<vmem>>, vector<1x32xf32>
    %4 = vector.broadcast %3 : vector<1x32xf32> to vector<16x32xf32>
    %5 = arith.addf %2, %4 : vector<16x32xf32>
    %cst_5 = arith.constant 0.000000e+00 : f32
    %6 = vector.broadcast %cst_5 : f32 to vector<16x32xf32>
    %7 = arith.maximumf %5, %6 : vector<16x32xf32>
    %c0_6 = arith.constant 0 : index
    %c0_7 = arith.constant 0 : index
    %8 = vector.load %arg8[%c0_6, %c0_7] : memref<32x32xf32, #tpu.memory_space<vmem>>, vector<32x32xf32>
    %cst_8 = arith.constant dense<0.000000e+00> : vector<16x32xf32>
    %9 = tpu.matmul %7, %8, %cst_8 {dimension_numbers = #tpu.dot_dimension_numbers<[1], [0], [0], [1], [0, 0, 1, 1], [], []>} : vector<16x32xf32>, vector<32x32xf32>, vector<16x32xf32> -> vector<16x32xf32>
    %c0_9 = arith.constant 0 : index
    %c0_10 = arith.constant 0 : index
    %10 = vector.load %arg9[%c0_9, %c0_10] : memref<1x32xf32, #tpu.memory_space<vmem>>, vector<1x32xf32>
    %11 = vector.broadcast %10 : vector<1x32xf32> to vector<16x32xf32>
    %12 = arith.addf %9, %11 : vector<16x32xf32>
    %cst_11 = arith.constant 0.000000e+00 : f32
    %13 = vector.broadcast %cst_11 : f32 to vector<16x32xf32>
    %14 = arith.maximumf %12, %13 : vector<16x32xf32>
    %c0_12 = arith.constant 0 : index
    %c0_13 = arith.constant 0 : index
    %15 = vector.load %arg10[%c0_12, %c0_13] : memref<32x512xf32, #tpu.memory_space<vmem>>, vector<32x512xf32>
    %cst_14 = arith.constant dense<0.000000e+00> : vector<16x512xf32>
    %16 = tpu.matmul %14, %15, %cst_14 {dimension_numbers = #tpu.dot_dimension_numbers<[1], [0], [0], [1], [0, 0, 1, 1], [], []>} : vector<16x32xf32>, vector<32x512xf32>, vector<16x512xf32> -> vector<16x512xf32>
    %c0_15 = arith.constant 0 : index
    %c0_16 = arith.constant 0 : index
    %17 = vector.load %arg11[%c0_15, %c0_16] : memref<1x512xf32, #tpu.memory_space<vmem>>, vector<1x512xf32>
    %18 = vector.broadcast %17 : vector<1x512xf32> to vector<16x512xf32>
    %19 = arith.addf %16, %18 : vector<16x512xf32>
    %c0_17 = arith.constant 0 : index
    %c0_18 = arith.constant 0 : index
    %20 = vector.load %arg2[%c0_17, %c0_18] : memref<8x2048xf32, #tpu.memory_space<vmem>>, vector<8x2048xf32>
    %cst_19 = arith.constant dense<0.000000e+00> : vector<16x2048xf32>
    %21 = tpu.matmul %0, %20, %cst_19 {dimension_numbers = #tpu.dot_dimension_numbers<[1], [0], [0], [1], [0, 0, 1, 1], [], []>} : vector<16x8xf32>, vector<8x2048xf32>, vector<16x2048xf32> -> vector<16x2048xf32>
    %c0_20 = arith.constant 0 : index
    %c0_21 = arith.constant 0 : index
    %22 = vector.load %arg3[%c0_20, %c0_21] : memref<1x2048xf32, #tpu.memory_space<vmem>>, vector<1x2048xf32>
    %23 = vector.broadcast %22 : vector<1x2048xf32> to vector<16x2048xf32>
    %24 = arith.addf %21, %23 : vector<16x2048xf32>
    %cst_22 = arith.constant 0.000000e+00 : f32
    %25 = vector.broadcast %cst_22 : f32 to vector<16x2048xf32>
    %26 = arith.maximumf %24, %25 : vector<16x2048xf32>
    %27 = tpu.iota {dimensions = array<i32: 1>} : vector<1x128xi32>
    %c25_i32 = arith.constant 25 : i32
    %28 = vector.broadcast %c25_i32 : i32 to vector<1x128xi32>
    %29 = arith.cmpi slt, %27, %28 : vector<1x128xi32>
    %30 = vector.extract_strided_slice %19 {offsets = [0, 0], sizes = [16, 128], strides = [1, 1]} : vector<16x512xf32> to vector<16x128xf32>
    %cst_23 = arith.constant -1.000000e+30 : f32
    %31 = vector.shape_cast %29 : vector<1x128xi1> to vector<1x128xi1>
    %32 = vector.broadcast %31 : vector<1x128xi1> to vector<16x128xi1>
    %33 = vector.broadcast %cst_23 : f32 to vector<16x128xf32>
    %34 = arith.select %32, %30, %33 : vector<16x128xi1>, vector<16x128xf32>
    %cst_24 = arith.constant dense<0xFF800000> : vector<16xf32>
    %35 = vector.multi_reduction <maximumf>, %34, %cst_24 [1] : vector<16x128xf32> to vector<16xf32>
    %36 = vector.shape_cast %35 : vector<16xf32> to vector<16x1xf32>
    %37 = vector.broadcast %36 : vector<16x1xf32> to vector<16x128xf32>
    %38 = arith.subf %34, %37 : vector<16x128xf32>
    %39 = math.exp %38 : vector<16x128xf32>
    %cst_25 = arith.constant dense<0.000000e+00> : vector<16xf32>
    %40 = vector.multi_reduction <add>, %39, %cst_25 [1] : vector<16x128xf32> to vector<16xf32>
    %41 = vector.shape_cast %40 : vector<16xf32> to vector<16x1xf32>
    %42 = tpu.reciprocal %41 {approx = true} : vector<16x1xf32> -> vector<16x1xf32>
    %43 = vector.broadcast %42 : vector<16x1xf32> to vector<16x128xf32>
    %44 = arith.mulf %39, %43 : vector<16x128xf32>
    %45 = vector.extract_strided_slice %26 {offsets = [0, 0], sizes = [16, 512], strides = [1, 1]} : vector<16x2048xf32> to vector<16x512xf32>
    %c0_26 = arith.constant 0 : index
    %c0_27 = arith.constant 0 : index
    %c0_28 = arith.constant 0 : index
    %46 = vector.load %arg4[%c0_26, %c0_27, %c0_28] : memref<4x512x128xf32, #tpu.memory_space<vmem>>, vector<1x512x128xf32>
    %47 = vector.shape_cast %46 : vector<1x512x128xf32> to vector<512x128xf32>
    %cst_29 = arith.constant dense<0.000000e+00> : vector<16x128xf32>
    %48 = tpu.matmul %45, %47, %cst_29 {dimension_numbers = #tpu.dot_dimension_numbers<[1], [0], [0], [1], [0, 0, 1, 1], [], []>} : vector<16x512xf32>, vector<512x128xf32>, vector<16x128xf32> -> vector<16x128xf32>
    %c0_30 = arith.constant 0 : index
    %c0_31 = arith.constant 0 : index
    %c0_32 = arith.constant 0 : index
    %49 = vector.load %arg5[%c0_30, %c0_31, %c0_32] : memref<4x1x128xf32, #tpu.memory_space<vmem>>, vector<1x1x128xf32>
    %50 = vector.shape_cast %49 : vector<1x1x128xf32> to vector<1x128xf32>
    %51 = vector.broadcast %50 : vector<1x128xf32> to vector<16x128xf32>
    %52 = arith.addf %48, %51 : vector<16x128xf32>
    %53 = arith.mulf %52, %44 : vector<16x128xf32>
    %cst_33 = arith.constant dense<0.000000e+00> : vector<16xf32>
    %54 = vector.multi_reduction <add>, %53, %cst_33 [1] : vector<16x128xf32> to vector<16xf32>
    %55 = vector.shape_cast %54 : vector<16xf32> to vector<16x1xf32>
    %56 = vector.extract_strided_slice %19 {offsets = [0, 128], sizes = [16, 128], strides = [1, 1]} : vector<16x512xf32> to vector<16x128xf32>
    %cst_34 = arith.constant -1.000000e+30 : f32
    %57 = vector.shape_cast %29 : vector<1x128xi1> to vector<1x128xi1>
    %58 = vector.broadcast %57 : vector<1x128xi1> to vector<16x128xi1>
    %59 = vector.broadcast %cst_34 : f32 to vector<16x128xf32>
    %60 = arith.select %58, %56, %59 : vector<16x128xi1>, vector<16x128xf32>
    %cst_35 = arith.constant dense<0xFF800000> : vector<16xf32>
    %61 = vector.multi_reduction <maximumf>, %60, %cst_35 [1] : vector<16x128xf32> to vector<16xf32>
    %62 = vector.shape_cast %61 : vector<16xf32> to vector<16x1xf32>
    %63 = vector.broadcast %62 : vector<16x1xf32> to vector<16x128xf32>
    %64 = arith.subf %60, %63 : vector<16x128xf32>
    %65 = math.exp %64 : vector<16x128xf32>
    %cst_36 = arith.constant dense<0.000000e+00> : vector<16xf32>
    %66 = vector.multi_reduction <add>, %65, %cst_36 [1] : vector<16x128xf32> to vector<16xf32>
    %67 = vector.shape_cast %66 : vector<16xf32> to vector<16x1xf32>
    %68 = tpu.reciprocal %67 {approx = true} : vector<16x1xf32> -> vector<16x1xf32>
    %69 = vector.broadcast %68 : vector<16x1xf32> to vector<16x128xf32>
    %70 = arith.mulf %65, %69 : vector<16x128xf32>
    %71 = vector.extract_strided_slice %26 {offsets = [0, 512], sizes = [16, 512], strides = [1, 1]} : vector<16x2048xf32> to vector<16x512xf32>
    %c1 = arith.constant 1 : index
    %c0_37 = arith.constant 0 : index
    %c0_38 = arith.constant 0 : index
    %72 = vector.load %arg4[%c1, %c0_37, %c0_38] : memref<4x512x128xf32, #tpu.memory_space<vmem>>, vector<1x512x128xf32>
    %73 = vector.shape_cast %72 : vector<1x512x128xf32> to vector<512x128xf32>
    %cst_39 = arith.constant dense<0.000000e+00> : vector<16x128xf32>
    %74 = tpu.matmul %71, %73, %cst_39 {dimension_numbers = #tpu.dot_dimension_numbers<[1], [0], [0], [1], [0, 0, 1, 1], [], []>} : vector<16x512xf32>, vector<512x128xf32>, vector<16x128xf32> -> vector<16x128xf32>
    %c1_40 = arith.constant 1 : index
    %c0_41 = arith.constant 0 : index
    %c0_42 = arith.constant 0 : index
    %75 = vector.load %arg5[%c1_40, %c0_41, %c0_42] : memref<4x1x128xf32, #tpu.memory_space<vmem>>, vector<1x1x128xf32>
    %76 = vector.shape_cast %75 : vector<1x1x128xf32> to vector<1x128xf32>
    %77 = vector.broadcast %76 : vector<1x128xf32> to vector<16x128xf32>
    %78 = arith.addf %74, %77 : vector<16x128xf32>
    %79 = arith.mulf %78, %70 : vector<16x128xf32>
    %cst_43 = arith.constant dense<0.000000e+00> : vector<16xf32>
    %80 = vector.multi_reduction <add>, %79, %cst_43 [1] : vector<16x128xf32> to vector<16xf32>
    %81 = vector.shape_cast %80 : vector<16xf32> to vector<16x1xf32>
    %82 = vector.extract_strided_slice %19 {offsets = [0, 256], sizes = [16, 128], strides = [1, 1]} : vector<16x512xf32> to vector<16x128xf32>
    %cst_44 = arith.constant -1.000000e+30 : f32
    %83 = vector.shape_cast %29 : vector<1x128xi1> to vector<1x128xi1>
    %84 = vector.broadcast %83 : vector<1x128xi1> to vector<16x128xi1>
    %85 = vector.broadcast %cst_44 : f32 to vector<16x128xf32>
    %86 = arith.select %84, %82, %85 : vector<16x128xi1>, vector<16x128xf32>
    %cst_45 = arith.constant dense<0xFF800000> : vector<16xf32>
    %87 = vector.multi_reduction <maximumf>, %86, %cst_45 [1] : vector<16x128xf32> to vector<16xf32>
    %88 = vector.shape_cast %87 : vector<16xf32> to vector<16x1xf32>
    %89 = vector.broadcast %88 : vector<16x1xf32> to vector<16x128xf32>
    %90 = arith.subf %86, %89 : vector<16x128xf32>
    %91 = math.exp %90 : vector<16x128xf32>
    %cst_46 = arith.constant dense<0.000000e+00> : vector<16xf32>
    %92 = vector.multi_reduction <add>, %91, %cst_46 [1] : vector<16x128xf32> to vector<16xf32>
    %93 = vector.shape_cast %92 : vector<16xf32> to vector<16x1xf32>
    %94 = tpu.reciprocal %93 {approx = true} : vector<16x1xf32> -> vector<16x1xf32>
    %95 = vector.broadcast %94 : vector<16x1xf32> to vector<16x128xf32>
    %96 = arith.mulf %91, %95 : vector<16x128xf32>
    %97 = vector.extract_strided_slice %26 {offsets = [0, 1024], sizes = [16, 512], strides = [1, 1]} : vector<16x2048xf32> to vector<16x512xf32>
    %c2 = arith.constant 2 : index
    %c0_47 = arith.constant 0 : index
    %c0_48 = arith.constant 0 : index
    %98 = vector.load %arg4[%c2, %c0_47, %c0_48] : memref<4x512x128xf32, #tpu.memory_space<vmem>>, vector<1x512x128xf32>
    %99 = vector.shape_cast %98 : vector<1x512x128xf32> to vector<512x128xf32>
    %cst_49 = arith.constant dense<0.000000e+00> : vector<16x128xf32>
    %100 = tpu.matmul %97, %99, %cst_49 {dimension_numbers = #tpu.dot_dimension_numbers<[1], [0], [0], [1], [0, 0, 1, 1], [], []>} : vector<16x512xf32>, vector<512x128xf32>, vector<16x128xf32> -> vector<16x128xf32>
    %c2_50 = arith.constant 2 : index
    %c0_51 = arith.constant 0 : index
    %c0_52 = arith.constant 0 : index
    %101 = vector.load %arg5[%c2_50, %c0_51, %c0_52] : memref<4x1x128xf32, #tpu.memory_space<vmem>>, vector<1x1x128xf32>
    %102 = vector.shape_cast %101 : vector<1x1x128xf32> to vector<1x128xf32>
    %103 = vector.broadcast %102 : vector<1x128xf32> to vector<16x128xf32>
    %104 = arith.addf %100, %103 : vector<16x128xf32>
    %105 = arith.mulf %104, %96 : vector<16x128xf32>
    %cst_53 = arith.constant dense<0.000000e+00> : vector<16xf32>
    %106 = vector.multi_reduction <add>, %105, %cst_53 [1] : vector<16x128xf32> to vector<16xf32>
    %107 = vector.shape_cast %106 : vector<16xf32> to vector<16x1xf32>
    %108 = vector.extract_strided_slice %19 {offsets = [0, 384], sizes = [16, 128], strides = [1, 1]} : vector<16x512xf32> to vector<16x128xf32>
    %cst_54 = arith.constant -1.000000e+30 : f32
    %109 = vector.shape_cast %29 : vector<1x128xi1> to vector<1x128xi1>
    %110 = vector.broadcast %109 : vector<1x128xi1> to vector<16x128xi1>
    %111 = vector.broadcast %cst_54 : f32 to vector<16x128xf32>
    %112 = arith.select %110, %108, %111 : vector<16x128xi1>, vector<16x128xf32>
    %cst_55 = arith.constant dense<0xFF800000> : vector<16xf32>
    %113 = vector.multi_reduction <maximumf>, %112, %cst_55 [1] : vector<16x128xf32> to vector<16xf32>
    %114 = vector.shape_cast %113 : vector<16xf32> to vector<16x1xf32>
    %115 = vector.broadcast %114 : vector<16x1xf32> to vector<16x128xf32>
    %116 = arith.subf %112, %115 : vector<16x128xf32>
    %117 = math.exp %116 : vector<16x128xf32>
    %cst_56 = arith.constant dense<0.000000e+00> : vector<16xf32>
    %118 = vector.multi_reduction <add>, %117, %cst_56 [1] : vector<16x128xf32> to vector<16xf32>
    %119 = vector.shape_cast %118 : vector<16xf32> to vector<16x1xf32>
    %120 = tpu.reciprocal %119 {approx = true} : vector<16x1xf32> -> vector<16x1xf32>
    %121 = vector.broadcast %120 : vector<16x1xf32> to vector<16x128xf32>
    %122 = arith.mulf %117, %121 : vector<16x128xf32>
    %123 = vector.extract_strided_slice %26 {offsets = [0, 1536], sizes = [16, 512], strides = [1, 1]} : vector<16x2048xf32> to vector<16x512xf32>
    %c3 = arith.constant 3 : index
    %c0_57 = arith.constant 0 : index
    %c0_58 = arith.constant 0 : index
    %124 = vector.load %arg4[%c3, %c0_57, %c0_58] : memref<4x512x128xf32, #tpu.memory_space<vmem>>, vector<1x512x128xf32>
    %125 = vector.shape_cast %124 : vector<1x512x128xf32> to vector<512x128xf32>
    %cst_59 = arith.constant dense<0.000000e+00> : vector<16x128xf32>
    %126 = tpu.matmul %123, %125, %cst_59 {dimension_numbers = #tpu.dot_dimension_numbers<[1], [0], [0], [1], [0, 0, 1, 1], [], []>} : vector<16x512xf32>, vector<512x128xf32>, vector<16x128xf32> -> vector<16x128xf32>
    %c3_60 = arith.constant 3 : index
    %c0_61 = arith.constant 0 : index
    %c0_62 = arith.constant 0 : index
    %127 = vector.load %arg5[%c3_60, %c0_61, %c0_62] : memref<4x1x128xf32, #tpu.memory_space<vmem>>, vector<1x1x128xf32>
    %128 = vector.shape_cast %127 : vector<1x1x128xf32> to vector<1x128xf32>
    %129 = vector.broadcast %128 : vector<1x128xf32> to vector<16x128xf32>
    %130 = arith.addf %126, %129 : vector<16x128xf32>
    %131 = arith.mulf %130, %122 : vector<16x128xf32>
    %cst_63 = arith.constant dense<0.000000e+00> : vector<16xf32>
    %132 = vector.multi_reduction <add>, %131, %cst_63 [1] : vector<16x128xf32> to vector<16xf32>
    %133 = vector.shape_cast %132 : vector<16xf32> to vector<16x1xf32>
    %134 = tpu.concatenate %55, %81, %107, %133 in 1 : vector<16x1xf32>, vector<16x1xf32>, vector<16x1xf32>, vector<16x1xf32> -> vector<16x4xf32>
    %c0_64 = arith.constant 0 : index
    %c0_65 = arith.constant 0 : index
    %135 = vector.load %arg12[%c0_64, %c0_65] : memref<16x4xf32, #tpu.memory_space<vmem>>, vector<16x4xf32>
    tpu.vector_store %arg12[%c0_64, %c0_65], %134 {strides = array<i32>} : memref<16x4xf32, #tpu.memory_space<vmem>>, vector<16x4xf32>,
    return
  }
  func.func @transform_0(%arg0: i32) -> (i32, i32) {
    %c0_i32 = arith.constant 0 : i32
    %c0_i32_0 = arith.constant 0 : i32
    return %arg0, %c0_i32 : i32, i32
  }
  func.func @transform_1(%arg0: i32) -> (i32, i32) {
    %c0_i32 = arith.constant 0 : i32
    %c0_i32_0 = arith.constant 0 : i32
    %c0_i32_1 = arith.constant 0 : i32
    return %c0_i32, %c0_i32_0 : i32, i32
  }
  func.func @transform_2(%arg0: i32) -> (i32, i32) {
    %c0_i32 = arith.constant 0 : i32
    %c0_i32_0 = arith.constant 0 : i32
    %c0_i32_1 = arith.constant 0 : i32
    return %c0_i32, %c0_i32_0 : i32, i32
  }
  func.func @transform_3(%arg0: i32) -> (i32, i32, i32) {
    %c0_i32 = arith.constant 0 : i32
    %c0_i32_0 = arith.constant 0 : i32
    %c0_i32_1 = arith.constant 0 : i32
    %c0_i32_2 = arith.constant 0 : i32
    return %c0_i32, %c0_i32_0, %c0_i32_1 : i32, i32, i32
  }
  func.func @transform_4(%arg0: i32) -> (i32, i32, i32) {
    %c0_i32 = arith.constant 0 : i32
    %c0_i32_0 = arith.constant 0 : i32
    %c0_i32_1 = arith.constant 0 : i32
    %c0_i32_2 = arith.constant 0 : i32
    return %c0_i32, %c0_i32_0, %c0_i32_1 : i32, i32, i32
  }
  func.func @transform_5(%arg0: i32) -> (i32, i32) {
    %c0_i32 = arith.constant 0 : i32
    %c0_i32_0 = arith.constant 0 : i32
    %c0_i32_1 = arith.constant 0 : i32
    return %c0_i32, %c0_i32_0 : i32, i32
  }
  func.func @transform_6(%arg0: i32) -> (i32, i32) {
    %c0_i32 = arith.constant 0 : i32
    %c0_i32_0 = arith.constant 0 : i32
    %c0_i32_1 = arith.constant 0 : i32
    return %c0_i32, %c0_i32_0 : i32, i32
  }
  func.func @transform_7(%arg0: i32) -> (i32, i32) {
    %c0_i32 = arith.constant 0 : i32
    %c0_i32_0 = arith.constant 0 : i32
    %c0_i32_1 = arith.constant 0 : i32
    return %c0_i32, %c0_i32_0 : i32, i32
  }
  func.func @transform_8(%arg0: i32) -> (i32, i32) {
    %c0_i32 = arith.constant 0 : i32
    %c0_i32_0 = arith.constant 0 : i32
    %c0_i32_1 = arith.constant 0 : i32
    return %c0_i32, %c0_i32_0 : i32, i32
  }
  func.func @transform_9(%arg0: i32) -> (i32, i32) {
    %c0_i32 = arith.constant 0 : i32
    %c0_i32_0 = arith.constant 0 : i32
    %c0_i32_1 = arith.constant 0 : i32
    return %c0_i32, %c0_i32_0 : i32, i32
  }
  func.func @transform_10(%arg0: i32) -> (i32, i32) {
    %c0_i32 = arith.constant 0 : i32
    %c0_i32_0 = arith.constant 0 : i32
    %c0_i32_1 = arith.constant 0 : i32
    return %c0_i32, %c0_i32_0 : i32, i32
  }
  func.func @transform_11(%arg0: i32) -> (i32, i32) {
    %c0_i32 = arith.constant 0 : i32
    %c0_i32_0 = arith.constant 0 : i32
    return %arg0, %c0_i32 : i32, i32
  }
}

</mosaic_0001>

<bundles_post_ra>
// kernel: tpu_custom_call.1
= control target key start
LH: loop header
LB: loop body
LE: loop exit
PB: predicated region body
PF: predicated region fallthrough
CT: control target
= control target key end

     0   :  { %16 = vsyncpa [#allocation3], 0  ;;  %s3533_s0 = inlined_call_operand.vmem [shape: f32[16,8], index: 0, kind: input, shape index: {}]   ;;  %s3534_s1 = inlined_call_operand.hbm [shape: f32[8,2048], index: 1, kind: input, shape index: {}]   ;;  %s3535_s2 = inlined_call_operand.vmem [shape: f32[1,2048], index: 2, kind: input, shape index: {}]   ;;  %s3536_s3 = inlined_call_operand.hbm [shape: f32[4,512,128], index: 3, kind: input, shape index: {}]   ;;  %s3537_s4 = inlined_call_operand.hbm [shape: f32[4,1,128], index: 4, kind: input, shape index: {}]   ;;  %s3538_s5 = inlined_call_operand.hbm [shape: f32[8,32], index: 5, kind: input, shape index: {}]   ;;  %s3539_s6 = inlined_call_operand.vmem [shape: f32[1,32], index: 6, kind: input, shape index: {}]   ;;  %s3540_s7 = inlined_call_operand.vmem [shape: f32[32,32], index: 7, kind: input, shape index: {}]   ;;  %s3541_s8 = inlined_call_operand.vmem [shape: f32[1,32], index: 8, kind: input, shape index: {}]   ;;  %s3542_s9 = inlined_call_operand.hbm [shape: f32[32,512], index: 9, kind: input, shape index: {}]   ;;  %s3543_s10 = inlined_call_operand.vmem [shape: f32[1,512], index: 10, kind: input, shape index: {}]   ;;  %s3544_s11 = inlined_call_operand.vmem [shape: f32[16,4], index: 11, kind: output, shape index: {}]  }
   0x1   :  { %17 = vsyncpa [#allocation5], 0 }
   0x2   :  { %18 = vsyncpa [#allocation8], 0  ;;  %s3058_s17 = smov [#allocation4]   ;;  %s2942_s21 = scalar_lea.hbm %s3536_s3, 32768 }
   0x3   :  { %s38_s18 = sshll.u32 %s3058_s17, 4  ;;  %p2943_p0 = scmp.ne.s32.totalorder %s3536_s3, %s2942_s21  ;;  %s39_s18 = int_to_ptr.vmem [resolvable:$true] %s38_s18 }
   0x4   :  { %p2946_p1 = scmp.lt.u32.totalorder %s2942_s21, %s3536_s3 }
   0x6   :  { %p2948_p2 = pnand %p2946_p1, %p2943_p0 }
   0x8   :  { %2951 = shalt.err (!%p2948_p2)
}
   0x9   :  { %s2952_s26 = scalar_lea.vmem %s39_s18, 32768  ;;  %p2957_p4 = scmp.lt.s32.totalorder %s39_s18, %s39_s18 }
   0xa   :  { %p2953_p3 = scmp.ne.s32.totalorder %s39_s18, %s2952_s26  ;;  %p2958_p5 = scmp.lt.s32.totalorder %s2952_s26, %s2952_s26 }
   0xc   :  { %p2959_p6 = por %p2958_p5, %p2957_p4 }
   0xe   :  { %p2960_p7 = pnand %p2959_p6, %p2953_p3 }
  0x10   :  { %2963 = shalt.err (!%p2960_p7)
}
  0x11   :  { %s3059_s27 = smov 128   ;;  %s3060_s28 = smov 8  }
  0x12   :  { %44 = dma.hbm_to_vmem [thread:$0]  %s3536_s3, 32768, %s39_s18, [#allocation5], %s3059_s27, %s3059_s27, %s3060_s28  }
  0x13   :  { %s3061_s12 = smov [#allocation7]   ;;  %s3062_s14 = smov [#allocation2]  }
  0x14   :  { %s63_s13 = sshll.u32 %s3061_s12, 4  ;;  %s27_s15 = sshll.u32 %s3062_s14, 4  ;;  %s64_s13 = int_to_ptr.vmem [resolvable:$true] %s63_s13  ;;  %s28_s15 = int_to_ptr.vmem [resolvable:$true] %s27_s15 }
  0x15   :  { %s2964_s19 = scalar_lea.hbm %s3538_s5, 128 }
  0x16   :  { %p2965_p8 = scmp.ne.s32.totalorder %s3538_s5, %s2964_s19  ;;  %p2968_p9 = scmp.lt.u32.totalorder %s2964_s19, %s3538_s5 }
  0x18   :  { %p2970_p10 = pnand %p2968_p9, %p2965_p8 }
  0x1a   :  { %2973 = shalt.err (!%p2970_p10)
}
  0x1b   :  { %s2974_s3 = scalar_lea.vmem %s64_s13, 128  ;;  %p2979_p12 = scmp.lt.s32.totalorder %s64_s13, %s64_s13 }
  0x1c   :  { %p2975_p11 = scmp.ne.s32.totalorder %s64_s13, %s2974_s3  ;;  %p2980_p13 = scmp.lt.s32.totalorder %s2974_s3, %s2974_s3 }
  0x1e   :  { %p2981_p0 = por %p2980_p13, %p2979_p12 }
  0x20   :  { %p2982_p1 = pnand %p2981_p0, %p2975_p11 }
  0x22   :  { %2985 = shalt.err (!%p2982_p1)
}
  0x23   :  { %66 = dma.hbm_to_vmem [thread:$0]  %s3538_s5, 128, %s64_s13, [#allocation8]  }
  0x24   :  { %s2986_s27 = scalar_lea.hbm %s3534_s1, 2048 }
  0x25   :  { %p2987_p2 = scmp.ne.s32.totalorder %s3534_s1, %s2986_s27  ;;  %p2990_p3 = scmp.lt.u32.totalorder %s2986_s27, %s3534_s1 }
  0x27   :  { %p2992_p4 = pnand %p2990_p3, %p2987_p2 }
  0x29   :  { %2995 = shalt.err (!%p2992_p4)
}
  0x2a   :  { %s2996_s14 = scalar_lea.vmem %s28_s15, 2048  ;;  %p3001_p6 = scmp.lt.s32.totalorder %s28_s15, %s28_s15 }
  0x2b   :  { %p2997_p5 = scmp.ne.s32.totalorder %s28_s15, %s2996_s14  ;;  %p3002_p7 = scmp.lt.s32.totalorder %s2996_s14, %s2996_s14 }
  0x2d   :  { %p3003_p8 = por %p3002_p7, %p3001_p6 }
  0x2f   :  { %p3004_p9 = pnand %p3003_p8, %p2997_p5 }
  0x31   :  { %3007 = shalt.err (!%p3004_p9)
}
  0x32   :  { %30 = dma.hbm_to_vmem [thread:$0]  %s3534_s1, 2048, %s28_s15, [#allocation3]  }
  0x33   :  { %s3063_s16 = smov [#allocation6]   ;;  %s3008_s21 = scalar_lea.hbm %s3537_s4, 64 }
  0x34   :  { %s50_s17 = sshll.u32 %s3063_s16, 4  ;;  %p3009_p10 = scmp.ne.s32.totalorder %s3537_s4, %s3008_s21  ;;  %s51_s17 = int_to_ptr.vmem [resolvable:$true] %s50_s17 }
  0x35   :  { %p3012_p11 = scmp.lt.u32.totalorder %s3008_s21, %s3537_s4 }
  0x37   :  { %p3014_p12 = pnand %p3012_p11, %p3009_p10 }
  0x39   :  { %3017 = shalt.err (!%p3014_p12)
}
  0x3a   :  { %s3018_s24 = scalar_lea.vmem %s51_s17, 64  ;;  %p3023_p0 = scmp.lt.s32.totalorder %s51_s17, %s51_s17 }
  0x3b   :  { %p3019_p13 = scmp.ne.s32.totalorder %s51_s17, %s3018_s24  ;;  %p3024_p1 = scmp.lt.s32.totalorder %s3018_s24, %s3018_s24 }
  0x3d   :  { %p3025_p2 = por %p3024_p1, %p3023_p0 }
  0x3f   :  { %p3026_p3 = pnand %p3025_p2, %p3019_p13 }
  0x41   :  { %3029 = shalt.err (!%p3026_p3)
}
  0x42   :  { %s3064_s1 = smov 16   ;;  %s3065_s15 = smov 1  }
  0x43   :  { %56 = dma.hbm_to_vmem [thread:$0]  %s3537_s4, 64, %s51_s17, [#allocation5], %s3064_s1, %s3064_s1, %s3065_s15  }
  0x44   :  { %s3066_s27 = smov [#allocation9]   ;;  %s3030_s12 = scalar_lea.hbm %s3542_s9, 2048 }
  0x45   :  { %s78_s28 = sshll.u32 %s3066_s27, 4  ;;  %p3031_p4 = scmp.ne.s32.totalorder %s3542_s9, %s3030_s12  ;;  %s79_s28 = int_to_ptr.vmem [resolvable:$true] %s78_s28 }
  0x46   :  { %p3034_p5 = scmp.lt.u32.totalorder %s3030_s12, %s3542_s9 }
  0x48   :  { %p3036_p6 = pnand %p3034_p5, %p3031_p4 }
  0x4a   :  { %3039 = shalt.err (!%p3036_p6)
}
  0x4b   :  { %s3040_s19 = scalar_lea.vmem %s79_s28, 2048  ;;  %p3045_p8 = scmp.lt.s32.totalorder %s79_s28, %s79_s28 }
  0x4c   :  { %p3041_p7 = scmp.ne.s32.totalorder %s79_s28, %s3040_s19  ;;  %p3046_p9 = scmp.lt.s32.totalorder %s3040_s19, %s3040_s19 }
  0x4e   :  { %p3047_p10 = por %p3046_p9, %p3045_p8 }
  0x50   :  { %p3048_p11 = pnand %p3047_p10, %p3041_p7 }
  0x52   :  { %3051 = shalt.err (!%p3048_p11)
}
  0x53   :  { %s3067_s4 = smov 512   ;;  %s3068_s17 = smov 32  }
  0x54   :  { %84 = dma.hbm_to_vmem [thread:$0]  %s3542_s9, 2048, %s79_s28, [#allocation8], %s3067_s4, %s3067_s4, %s3068_s17  }
  0x55   :  { %3052 = dma.done.wait [#allocation3], 2048  }
  0x56   :  { %3053 = vsyncadd [#allocation3], 4294965248 }
  0x57   :  { %3054 = dma.done.wait [#allocation5], 32832  }
  0x58   :  { %3055 = vsyncadd [#allocation5], 4294934464 }
  0x59   :  { %3056 = dma.done.wait [#allocation8], 2176  }
  0x5a   :  { %3057 = vsyncadd [#allocation8], 4294965120  ;;  %vm112_vm0 = vcmask 64512   ;;  %v104_v0 = vld [vmem:[#allocation7] sm:$0xff]  ;;  %v3193_v1 = vld [vmem:[%s3533_s0] sm:$0xff]  ;;  %vm207_vm1 = vcmask 261120  }
  0x5b   :  { %v3198_v2 = vld [vmem:[%s3533_s0 + $0x8] sm:$0xff]  ;;  %2598 = vmatprep.subr.mxu0 %v104_v0  ;;  %2600 = vmatprep.mubr.msk.f32.mxu0 %vm112_vm0, %v3193_v1  ;;  %v196_v3 = vld [vmem:[%s3540_s7] sm:$0xff]  ;;  %v198_v6 = vld [vmem:[%s3540_s7 + $0x10] sm:$0xff]  ;;  %v3069_v40 = vmov 0.0   ;;  %vm2236_vm3 = vcmask 7168   ;;  %vm2239_vm4 = vcmask 15360  }
  0x5c   :  { %v197_v4 = vld [vmem:[%s3540_s7 + $0x8] sm:$0xff]  ;;  %2599 = vmatpush3.msra.mxu0 %v104_v0  ;;  %v199_v7 = vld [vmem:[%s3540_s7 + $0x18] sm:$0xff]  ;;  %v2255_v18 = vld [vmem:[%s3539_s6] ss:$0 sm:$0xff]  ;;  %vm2242_vm5 = vcmask 23552   ;;  %vm2245_vm6 = vcmask 31744  }
  0x5d   :  { %v2614_v5 = vpack.c.bf16 %v197_v4, %v196_v3  ;;  %2601 = vmatmul.mubr.msk.f32.vlgmr.msra.gmra.mrb[0].mxu0 %vm112_vm0, %v3198_v2  ;;  %v2618_v8 = vpack.c.bf16 %v199_v7, %v198_v6  ;;  %v292_v9 = vld [vmem:[#allocation9 + $0x8] sm:$0xff]  ;;  %v294_v11 = vld [vmem:[#allocation9 + $0x18] sm:$0xff]  ;;  %v291_v14 = vld [vmem:[#allocation9] sm:$0xff] }
  0x5e   :  { %v296_v10 = vld [vmem:[#allocation9 + $0x28] sm:$0xff]  ;;  %v298_v13 = vld [vmem:[#allocation9 + $0x38] sm:$0xff]  ;;  %v295_v15 = vld [vmem:[#allocation9 + $0x20] sm:$0xff]  ;;  %399 = vmatprep.mubr.f32.mxu0 %v3069_v40 }
  0x5f   :  { %2615 = vmatprep.subr.bf16.mxu1 %v2614_v5  ;;  %v2622_v12 = vpack.c.bf16 %v296_v10, %v292_v9  ;;  %v2630_v16 = vpack.c.bf16 %v298_v13, %v294_v11  ;;  %v2624_v17 = vpack.c.bf16 %v295_v15, %v291_v14  ;;  %v293_v22 = vld [vmem:[#allocation9 + $0x10] sm:$0xff]  ;;  %v302_v28 = vld [vmem:[#allocation9 + $0x58] sm:$0xff]  ;;  %v300_v30 = vld [vmem:[#allocation9 + $0x48] sm:$0xff] }
  0x60   :  { %2617 = vmatpush3.bf16.msra.mxu1 %v2614_v5  ;;  %v297_v23 = vld [vmem:[#allocation9 + $0x30] sm:$0xff]  ;;  %v306_v29 = vld [vmem:[#allocation9 + $0x78] sm:$0xff]  ;;  %v304_v31 = vld [vmem:[#allocation9 + $0x68] sm:$0xff] }
  0x61   :  { %2619 = vmatprep.subr.bf16.mxu1 %v2618_v8  ;;  %2623 = vmatprep.subr.bf16.mxu0 %v2622_v12  ;;  %v2632_v26 = vpack.c.bf16 %v297_v23, %v293_v22  ;;  %v2634_v32 = vpack.c.bf16 %v306_v29, %v302_v28  ;;  %v301_v33 = vld [vmem:[#allocation9 + $0x50] sm:$0xff]  ;;  %v2626_v34 = vpack.c.bf16 %v304_v31, %v300_v30  ;;  %v299_v35 = vld [vmem:[#allocation9 + $0x40] sm:$0xff] }
  0x62   :  { %2625 = vmatpush1.bf16.msra.mxu0 %v2624_v17  ;;  %v303_v36 = vld [vmem:[#allocation9 + $0x60] sm:$0xff]  ;;  %v305_v38 = vld [vmem:[#allocation9 + $0x70] sm:$0xff] }
  0x63   :  { %v2628_v37 = vpack.c.bf16 %v303_v36, %v299_v35  ;;  %2627 = vmatprep.subr.bf16.mxu0 %v2626_v34  ;;  %v2636_v39 = vpack.c.bf16 %v305_v38, %v301_v33  ;;  %v492_v41 = vld [vmem:[#allocation2 + $0x18] sm:$0xff]  ;;  %v2258_v42 = vld [vmem:[%s3541_s8] ss:$0 sm:$0xff]  ;;  %v490_v51 = vld [vmem:[#allocation2 + $0x8] sm:$0xff] }
  0x64   :  { %2621 = vmatpush3.bf16.msra.mxu1 %v2618_v8  ;;  %v491_v48 = vld [vmem:[#allocation2 + $0x10] sm:$0xff]  ;;  %v496_v50 = vld [vmem:[#allocation2 + $0x38] sm:$0xff]  ;;  %v489_v54 = vld [vmem:[#allocation2] sm:$0xff] }
  0x65   :  { %2894 = vmatprep.subr.bf16.mxu1 %v2630_v16  ;;  %v495_v52 = vld [vmem:[#allocation2 + $0x30] sm:$0xff]  ;;  %v500_v53 = vld [vmem:[#allocation2 + $0x58] sm:$0xff]  ;;  %v494_v55 = vld [vmem:[#allocation2 + $0x28] sm:$0xff] }
  0x66   :  { %2629 = vmatpush1.bf16.msra.mxu0 %v2628_v37  ;;  %v493_v56 = vld [vmem:[#allocation2 + $0x20] sm:$0xff]  ;;  %v498_v57 = vld [vmem:[#allocation2 + $0x48] sm:$0xff]  ;;  %v499_v58 = vld [vmem:[#allocation2 + $0x50] sm:$0xff] }
  0x67   :  { %2631 = vmatprep.subr.bf16.mxu0 %v2630_v16  ;;  %v504_v59 = vld [vmem:[#allocation2 + $0x78] sm:$0xff]  ;;  %v1310_v60 = vld [vmem:[#allocation4 + $0x180] sm:$0xff]  ;;  %v1311_v61 = vld [vmem:[#allocation4 + $0x188] sm:$0xff] }
  0x68   :  { %v497_v62 = vld [vmem:[#allocation2 + $0x40] sm:$0xff]  ;;  %v502_v63 = vld [vmem:[#allocation2 + $0x68] sm:$0xff]  ;;  %v503_v0 = vld [vmem:[#allocation2 + $0x70] sm:$0xff]  ;;  %v2670_v3 = vpack.c.bf16 %v1311_v61, %v1310_v60 }
  0x69   :  { %v1278_v4 = vld [vmem:[#allocation4 + $0x80] sm:$0xff]  ;;  %v1279_v5 = vld [vmem:[#allocation4 + $0x88] sm:$0xff]  ;;  %v1312_v8 = vld [vmem:[#allocation4 + $0x190] sm:$0xff] }
  0x6a   :  { %v1294_v6 = vld [vmem:[#allocation4 + $0x100] sm:$0xff]  ;;  %v1295_v7 = vld [vmem:[#allocation4 + $0x108] sm:$0xff]  ;;  %v1313_v9 = vld [vmem:[#allocation4 + $0x198] sm:$0xff]  ;;  %v2638_v11 = vpack.c.bf16 %v1279_v5, %v1278_v4 }
  0x6b   :  { %v501_v10 = vld [vmem:[#allocation2 + $0x60] sm:$0xff]  ;;  %v2672_v12 = vpack.c.bf16 %v1295_v7, %v1294_v6  ;;  %v2674_v13 = vpack.c.bf16 %v1313_v9, %v1312_v8  ;;  %v1296_v14 = vld [vmem:[#allocation4 + $0x110] sm:$0xff]  ;;  %v1297_v15 = vld [vmem:[#allocation4 + $0x118] sm:$0xff] }
  0x6c   :  { %v1314_v16 = vld [vmem:[#allocation4 + $0x1a0] sm:$0xff]  ;;  %v1315_v17 = vld [vmem:[#allocation4 + $0x1a8] sm:$0xff]  ;;  %v1281_v22 = vld [vmem:[#allocation4 + $0x98] sm:$0xff] }
  0x6d   :  { %v2678_v23 = vpack.c.bf16 %v1315_v17, %v1314_v16  ;;  %v1264_v30 = vld [vmem:[#allocation4 + $0x10] sm:$0xff]  ;;  %v1265_v31 = vld [vmem:[#allocation4 + $0x18] sm:$0xff]  ;;  %v1283_v34 = vld [vmem:[#allocation4 + $0xa8] sm:$0xff] }
  0x6e   :  { %v1300_v36 = vld [vmem:[#allocation4 + $0x130] sm:$0xff]  ;;  %v1301_v37 = vld [vmem:[#allocation4 + $0x138] sm:$0xff]  ;;  %v2644_v38 = vpack.c.bf16 %v1265_v31, %v1264_v30  ;;  %v1307_v17 = vld [vmem:[#allocation4 + $0x168] sm:$0xff] }
  0x6f   :  { %v1320_v60 = vld [vmem:[#allocation4 + $0x1d0] sm:$0xff]  ;;  %v1321_v61 = vld [vmem:[#allocation4 + $0x1d8] sm:$0xff] }
  0x70   :  { %v1305_v5 = vld [vmem:[#allocation4 + $0x158] sm:$0xff]  ;;  %v1272_v6 = vld [vmem:[#allocation4 + $0x50] sm:$0xff] }
  0x71   :  { %v1273_v7 = vld [vmem:[#allocation4 + $0x58] sm:$0xff]  ;;  %v1276_v30 = vld [vmem:[#allocation4 + $0x70] sm:$0xff] }
  0x72   :  { %v2660_v9 = vpack.c.bf16 %v1273_v7, %v1272_v6  ;;  %v1277_v31 = vld [vmem:[#allocation4 + $0x78] sm:$0xff]  ;;  %v1542_v6 = vld [vmem:[#allocation4 + $0x300] sm:$0xff]  ;;  %v1543_v7 = vld [vmem:[#allocation4 + $0x308] sm:$0xff] }
 0x130   :  { %v2602_v19 = vpop.f32.mrb[0].mxu0 }
 0x131   :  { %v191_v20 = vadd.f32 %v2602_v19, %v2255_v18  ;;  %v185_v21 = vpop.f32.mrb[1].mxu0  ;;  %v1263_v19 = vld [vmem:[#allocation4 + $0x8] sm:$0xff] }
 0x132   :  { %v186_v24 = vadd.f32 %v2255_v18, %v185_v21  ;;  %v1262_v18 = vld [vmem:[#allocation4] sm:$0xff]  ;;  %v2676_v21 = vpack.c.bf16 %v1297_v15, %v1296_v14  ;;  %v1291_v14 = vld [vmem:[#allocation4 + $0xe8] sm:$0xff] }
 0x133   :  { %v195_v27 = vmax.f32 %v191_v20, 0.0  ;;  %v1280_v20 = vld [vmem:[#allocation4 + $0x90] sm:$0xff]  ;;  %v2640_v28 = vpack.c.bf16 %v1263_v19, %v1262_v18  ;;  %v1306_v15 = vld [vmem:[#allocation4 + $0x160] sm:$0xff]  ;;  %v1275_v19 = vld [vmem:[#allocation4 + $0x68] sm:$0xff] }
 0x134   :  { %v194_v25 = vmax.f32 %v186_v24, 0.0  ;;  %v1298_v24 = vld [vmem:[#allocation4 + $0x120] sm:$0xff]  ;;  %v2642_v29 = vpack.c.bf16 %v1281_v22, %v1280_v20  ;;  %v2696_v20 = vpack.c.bf16 %v1307_v17, %v1306_v15  ;;  %v1324_v22 = vld [vmem:[#allocation4 + $0x1f0] sm:$0xff] }
 0x135   :  { %v1274_v18 = vld [vmem:[#allocation4 + $0x60] sm:$0xff] }
 0x136   :  { %2611 = vmatprep.mubr.msk.f32.mxu1 %vm207_vm1, %v194_v25  ;;  %v1299_v25 = vld [vmem:[#allocation4 + $0x128] sm:$0xff] }
 0x137   :  { %2612 = vmatmul.mubr.msk.f32.vlgmr.msra.gmra.mrb[0].mxu1 %vm207_vm1, %v195_v27  ;;  %v1317_v27 = vld [vmem:[#allocation4 + $0x1b8] sm:$0xff]  ;;  %v2680_v33 = vpack.c.bf16 %v1299_v25, %v1298_v24  ;;  %v1292_v24 = vld [vmem:[#allocation4 + $0xf0] sm:$0xff] }
 0x138   :  { %2896 = vmatpush1.bf16.msra.mxu1 %v2632_v26  ;;  %482 = vmatprep.mubr.f32.mxu1 %v3069_v40  ;;  %v1293_v25 = vld [vmem:[#allocation4 + $0xf8] sm:$0xff] }
 0x139   :  { %2895 = vmatprep.subr.bf16.mxu1 %v2634_v32 }
 0x13c   :  { %2897 = vmatpush1.bf16.msra.mxu1 %v2636_v39 }
 0x13d   :  { %666 = vmatprep.subr.mxu1 %v492_v41  ;;  %v1266_v41 = vld [vmem:[#allocation4 + $0x20] sm:$0xff] }
 0x20a   :  { %v2613_v43 = vpop.f32.mrb[0].mxu1 }
 0x20b   :  { %v286_v44 = vadd.f32 %v2613_v43, %v2258_v42  ;;  %v280_v45 = vpop.f32.mrb[1].mxu1  ;;  %v2684_v43 = vpack.c.bf16 %v1301_v37, %v1300_v36  ;;  %v1526_v37 = vld [vmem:[#allocation4 + $0x280] sm:$0xff] }
 0x20c   :  { %v281_v46 = vadd.f32 %v2258_v42, %v280_v45  ;;  %v1267_v42 = vld [vmem:[#allocation4 + $0x28] sm:$0xff]  ;;  %v1285_v45 = vld [vmem:[#allocation4 + $0xb8] sm:$0xff] }
 0x20d   :  { %v290_v47 = vmax.f32 %v286_v44, 0.0  ;;  %v1284_v44 = vld [vmem:[#allocation4 + $0xb0] sm:$0xff] }
 0x20e   :  { %v289_v49 = vmax.f32 %v281_v46, 0.0  ;;  %v2648_v46 = vpack.c.bf16 %v1267_v42, %v1266_v41  ;;  %v309_v41 = vlaneseq }
 0x20f   :  { %2264 = vmatmul.mubr.msk.f32.vlgmr.msra.gmra.mrb[2].mxu1 %vm207_vm1, %v290_v47 }
 0x210   :  { %2261 = vmatmul.mubr.msk.f32.vlgmr.msra.gmra.mrb[2].mxu0 %vm207_vm1, %v289_v49  ;;  %667 = vmatpush1.msra.mxu1 %v491_v48  ;;  %v3280_v42 = vshrl.u32 %v309_v41, 7 }
 0x211   :  { %2633 = vmatpush1.bf16.msra.mxu0 %v2632_v26  ;;  %405 = vmatprep.mubr.f32.mxu0 %v3069_v40  ;;  %v1316_v26 = vld [vmem:[#allocation4 + $0x1b0] sm:$0xff] }
 0x212   :  { %2635 = vmatprep.subr.bf16.mxu0 %v2634_v32  ;;  %730 = vmatprep.mubr.f32.mxu1 %v3069_v40  ;;  %v1282_v32 = vld [vmem:[#allocation4 + $0xa0] sm:$0xff]  ;;  %v2682_v35 = vpack.c.bf16 %v1317_v27, %v1316_v26  ;;  %v1308_v26 = vld [vmem:[#allocation4 + $0x170] sm:$0xff] }
 0x213   :  { %2267 = vmatmul.mubr.msk.f32.vlgmr.msra.gmra.mrb[4].mxu1 %vm112_vm0, %v3193_v1  ;;  %820 = vmatprep.subr.mxu1 %v496_v50  ;;  %v1319_v50 = vld [vmem:[#allocation4 + $0x1c8] sm:$0xff] }
 0x214   :  { %2262 = vmatmul.mubr.msk.f32.gmra.mrb[4].mxu0 %vm207_vm1, %v290_v47  ;;  %736 = vmatprep.mubr.f32.mxu1 %v3069_v40  ;;  %v1269_v47 = vld [vmem:[#allocation4 + $0x38] sm:$0xff] }
 0x215   :  { %2637 = vmatpush1.bf16.msra.mxu0 %v2636_v39  ;;  %476 = vmatprep.mubr.f32.mxu0 %v3069_v40  ;;  %v2646_v39 = vpack.c.bf16 %v1283_v34, %v1282_v32  ;;  %v1558_v34 = vld [vmem:[#allocation4 + $0x380] sm:$0xff] }
 0x216   :  { %589 = vmatprep.subr.mxu0 %v490_v51  ;;  %821 = vmatpush1.msra.mxu1 %v495_v52  ;;  %v1286_v52 = vld [vmem:[#allocation4 + $0xc0] sm:$0xff] }
 0x217   :  { %2268 = vmatmul.mubr.msk.f32.gmra.mrb[6].mxu1 %vm112_vm0, %v3198_v2  ;;  %974 = vmatprep.subr.mxu1 %v500_v53  ;;  %v1287_v53 = vld [vmem:[#allocation4 + $0xc8] sm:$0xff] }
 0x218   :  { %2263 = vmatmul.mubr.msk.f32.vlgmr.msra.gmra.mrb[6].mxu0 %vm207_vm1, %v289_v49  ;;  %884 = vmatprep.mubr.f32.mxu1 %v3069_v40  ;;  %v1318_v49 = vld [vmem:[#allocation4 + $0x1c0] sm:$0xff] }
 0x219   :  { %590 = vmatpush1.msra.mxu0 %v489_v54  ;;  %653 = vmatprep.mubr.f32.mxu0 %v3069_v40  ;;  %v2686_v51 = vpack.c.bf16 %v1319_v50, %v1318_v49  ;;  %v1302_v54 = vld [vmem:[#allocation4 + $0x140] sm:$0xff] }
 0x21a   :  { %743 = vmatprep.subr.mxu0 %v494_v55  ;;  %v2654_v55 = vpack.c.bf16 %v1287_v53, %v1286_v52 }
 0x21b   :  { %2271 = vmatmul.mubr.msk.f32.vlgmr.msra.gmra.mrb[8].mxu1 %vm112_vm0, %v3193_v1 }
 0x21c   :  { %2265 = vmatmul.mubr.msk.f32.vlgmr.msra.gmra.mrb[8].mxu0 %vm112_vm0, %v3193_v1  ;;  %890 = vmatprep.mubr.f32.mxu1 %v3069_v40 }
 0x21d   :  { %659 = vmatprep.mubr.f32.mxu0 %v3069_v40  ;;  %744 = vmatpush1.msra.mxu0 %v493_v56  ;;  %v1303_v56 = vld [vmem:[#allocation4 + $0x148] sm:$0xff] }
 0x21e   :  { %897 = vmatprep.subr.mxu0 %v498_v57  ;;  %975 = vmatpush1.msra.mxu1 %v499_v58  ;;  %v1271_v57 = vld [vmem:[#allocation4 + $0x48] sm:$0xff]  ;;  %v2688_v58 = vpack.c.bf16 %v1303_v56, %v1302_v54  ;;  %v3316_v54 = vsub.s32 3, %v3280_v42 }
 0x21f   :  { %2272 = vmatmul.mubr.msk.f32.gmra.mrb[10].mxu1 %vm112_vm0, %v3198_v2  ;;  %1128 = vmatprep.subr.mxu1 %v504_v59 }
 0x220   :  { %2266 = vmatmul.mubr.msk.f32.gmra.mrb[10].mxu0 %vm112_vm0, %v3198_v2  ;;  %1038 = vmatprep.mubr.f32.mxu1 %v3069_v40 }
 0x221   :  { %807 = vmatprep.mubr.f32.mxu0 %v3069_v40 }
 0x223   :  { %2275 = vmatmul.mubr.msk.f32.vlgmr.msra.gmra.mrb[12].mxu1 %vm112_vm0, %v3193_v1 }
 0x224   :  { %2269 = vmatmul.mubr.msk.f32.vlgmr.msra.gmra.mrb[12].mxu0 %vm112_vm0, %v3193_v1  ;;  %1044 = vmatprep.mubr.f32.mxu1 %v3069_v40 }
 0x225   :  { %813 = vmatprep.mubr.f32.mxu0 %v3069_v40  ;;  %898 = vmatpush1.msra.mxu0 %v497_v62  ;;  %v2690_v62 = vpack.c.bf16 %v1321_v61, %v1320_v60 }
 0x226   :  { %1051 = vmatprep.subr.mxu0 %v502_v63  ;;  %1129 = vmatpush1.msra.mxu1 %v503_v0  ;;  %v1288_v63 = vld [vmem:[#allocation4 + $0xd0] sm:$0xff]  ;;  %v1289_v0 = vld [vmem:[#allocation4 + $0xd8] sm:$0xff] }
 0x227   :  { %2276 = vmatmul.mubr.msk.f32.gmra.mrb[14].mxu1 %vm112_vm0, %v3198_v2  ;;  %2671 = vmatprep.subr.bf16.mxu1 %v2670_v3  ;;  %v1304_v3 = vld [vmem:[#allocation4 + $0x150] sm:$0xff]  ;;  %v2658_v4 = vpack.c.bf16 %v1289_v0, %v1288_v63 }
 0x228   :  { %2270 = vmatmul.mubr.msk.f32.gmra.mrb[14].mxu0 %vm112_vm0, %v3198_v2  ;;  %1192 = vmatprep.mubr.f32.mxu1 %v3069_v40  ;;  %v2692_v8 = vpack.c.bf16 %v1305_v5, %v1304_v3 }
 0x229   :  { %961 = vmatprep.mubr.f32.mxu0 %v3069_v40 }
 0x22b   :  { %2279 = vmatmul.mubr.msk.f32.vlgmr.msra.gmra.mrb[16].mxu1 %vm112_vm0, %v3193_v1 }
 0x22c   :  { %2273 = vmatmul.mubr.msk.f32.vlgmr.msra.gmra.mrb[16].mxu0 %vm112_vm0, %v3193_v1  ;;  %1198 = vmatprep.mubr.f32.mxu1 %v3069_v40 }
 0x22d   :  { %967 = vmatprep.mubr.f32.mxu0 %v3069_v40  ;;  %1052 = vmatpush1.msra.mxu0 %v501_v10  ;;  %v1322_v10 = vld [vmem:[#allocation4 + $0x1e0] sm:$0xff] }
 0x22e   :  { %2639 = vmatprep.subr.bf16.mxu0 %v2638_v11  ;;  %2673 = vmatpush3.bf16.msra.mxu1 %v2672_v12  ;;  %v1323_v11 = vld [vmem:[#allocation4 + $0x1e8] sm:$0xff] }
 0x22f   :  { %2280 = vmatmul.mubr.msk.f32.gmra.mrb[18].mxu1 %vm112_vm0, %v3198_v2  ;;  %2675 = vmatprep.subr.bf16.mxu1 %v2674_v13  ;;  %v2694_v12 = vpack.c.bf16 %v1323_v11, %v1322_v10  ;;  %v1290_v13 = vld [vmem:[#allocation4 + $0xe0] sm:$0xff]  ;;  %v1560_v11 = vld [vmem:[#allocation4 + $0x390] sm:$0xff] }
 0x230   :  { %2274 = vmatmul.mubr.msk.f32.gmra.mrb[18].mxu0 %vm112_vm0, %v3198_v2  ;;  %v2662_v16 = vpack.c.bf16 %v1291_v14, %v1290_v13  ;;  %v3545_v13 = vsub.s32 7, %v3280_v42 }
 0x231   :  { %1115 = vmatprep.mubr.f32.mxu0 %v3069_v40 }
 0x232   :  { %2677 = vmatpush3.bf16.msra.mxu1 %v2676_v21  ;;  %v2664_v21 = vpack.c.bf16 %v1275_v19, %v1274_v18 }
 0x233   :  { %2679 = vmatprep.subr.bf16.mxu1 %v2678_v23  ;;  %v1325_v23 = vld [vmem:[#allocation4 + $0x1f8] sm:$0xff] }
 0x234   :  { %2277 = vmatmul.mubr.msk.f32.vlgmr.msra.gmra.mrb[20].mxu0 %vm112_vm0, %v3193_v1  ;;  %v2650_v1 = vpack.c.bf16 %v1285_v45, %v1284_v44  ;;  %v2698_v27 = vpack.c.bf16 %v1325_v23, %v1324_v22  ;;  %v3286_v44 = vld [vmem:[%s3535_s2 + $0x8] sm:$0xff] }
 0x235   :  { %1121 = vmatprep.mubr.f32.mxu0 %v3069_v40  ;;  %2641 = vmatpush3.bf16.msra.mxu0 %v2640_v28  ;;  %v1268_v40 = vld [vmem:[#allocation4 + $0x30] sm:$0xff]  ;;  %v2666_v28 = vpack.c.bf16 %v1293_v25, %v1292_v24  ;;  %v1545_v25 = vld [vmem:[#allocation4 + $0x318] sm:$0xff] }
 0x236   :  { %2643 = vmatprep.subr.bf16.mxu0 %v2642_v29  ;;  %2681 = vmatpush3.bf16.msra.mxu1 %v2680_v33  ;;  %v2652_v48 = vpack.c.bf16 %v1269_v47, %v1268_v40  ;;  %v1309_v29 = vld [vmem:[#allocation4 + $0x178] sm:$0xff]  ;;  %v2668_v33 = vpack.c.bf16 %v1277_v31, %v1276_v30  ;;  %v3300_v40 = vsub.s32 0, %v3280_v42  ;;  %v3303_v47 = vsub.s32 1, %v3280_v42  ;;  %v1544_v24 = vld [vmem:[#allocation4 + $0x310] sm:$0xff]  ;;  %v1562_v31 = vld [vmem:[#allocation4 + $0x3a0] sm:$0xff] }
 0x237   :  { %2683 = vmatprep.subr.bf16.mxu1 %v2682_v35  ;;  %v2700_v32 = vpack.c.bf16 %v1309_v29, %v1308_v26  ;;  %v1559_v35 = vld [vmem:[#allocation4 + $0x388] sm:$0xff] }
 0x238   :  { %2278 = vmatmul.mubr.msk.f32.gmra.mrb[22].mxu0 %vm112_vm0, %v3198_v2  ;;  %v1270_v2 = vld [vmem:[#allocation4 + $0x40] sm:$0xff]  ;;  %v2734_v36 = vpack.c.bf16 %v1559_v35, %v1558_v34 }
 0x239   :  { %2645 = vmatpush3.bf16.msra.mxu0 %v2644_v38  ;;  %v2656_v59 = vpack.c.bf16 %v1271_v57, %v1270_v2  ;;  %v1527_v38 = vld [vmem:[#allocation4 + $0x288] sm:$0xff] }
 0x23a   :  { %2647 = vmatprep.subr.bf16.mxu0 %v2646_v39  ;;  %2685 = vmatpush3.bf16.msra.mxu1 %v2684_v43  ;;  %v2702_v39 = vpack.c.bf16 %v1527_v38, %v1526_v37  ;;  %v527_v43 = vsub.s32 4, %v3280_v42 }
 0x23b   :  { %2687 = vmatprep.subr.bf16.mxu1 %v2686_v51  ;;  %v3312_v51 = vld [vmem:[%s3535_s2] sm:$0xff] }
 0x23c   :  { %v3291_v45 = vrot.slane %v3286_v44, %v527_v43  ;;  %v524_v60 = vrot.slane %v3312_v51, %v3316_v54  ;;  %v512_v30 = vrot.slane %v3312_v51, %v3300_v40  ;;  %v3350_v34 = vrot.slane %v3312_v51, %v3545_v13  ;;  %v1811_v13 = vld [vmem:[#allocation4 + $0x5a0] sm:$0xff] }
 0x23d   :  { %2649 = vmatpush3.bf16.msra.mxu0 %v2648_v46  ;;  %v3294_v46 = vsub.s32 2, %v3280_v42  ;;  %v516_v37 = vrot.slane %v3312_v51, %v3303_v47 }
 0x23e   :  { %2651 = vmatprep.subr.bf16.mxu0 %v2650_v1  ;;  %2689 = vmatpush3.bf16.msra.mxu1 %v2688_v58  ;;  %v307_v1 = vld [vmem:[%s3543_s10] sm:$0xf] }
 0x23f   :  { %2691 = vmatprep.subr.bf16.mxu1 %v2690_v62  ;;  %v320_v49 = vrot.slane %v307_v1, %v3294_v46  ;;  %v312_v50 = vrot.slane %v307_v1, %v3300_v40  ;;  %v316_v52 = vrot.slane %v307_v1, %v3303_v47  ;;  %v520_v57 = vrot.slane %v3312_v51, %v3294_v46 }
 0x240   :  { %v324_v14 = vrot.slane %v307_v1, %v3316_v54  ;;  %v2740_v1 = vpack.c.bf16 %v1545_v25, %v1544_v24  ;;  %v1513_v25 = vld [vmem:[#allocation4 + $0x218] sm:$0xff] }
 0x241   :  { %2653 = vmatpush3.bf16.msra.mxu0 %v2652_v48  ;;  %v3305_v48 = vand.u32 127, %v309_v41 }
 0x242   :  { %2655 = vmatprep.subr.bf16.mxu0 %v2654_v55  ;;  %2693 = vmatpush3.bf16.msra.mxu1 %v2692_v8 }
 0x243   :  { %2695 = vmatprep.subr.bf16.mxu1 %v2694_v12  ;;  %vm1239_vm2 = vcmp.lt.s32.totalorder %v3305_v48, 25  ;;  %v1561_v12 = vld [vmem:[#allocation4 + $0x398] sm:$0xff] }
 0x244   :  { %v2738_v23 = vpack.c.bf16 %v1561_v12, %v1560_v11 }
 0x245   :  { %2657 = vmatpush3.bf16.msra.mxu0 %v2656_v59 }
 0x246   :  { %2659 = vmatprep.subr.bf16.mxu0 %v2658_v4  ;;  %2697 = vmatpush3.bf16.msra.mxu1 %v2696_v20  ;;  %v2736_v20 = vpack.c.bf16 %v1543_v7, %v1542_v6  ;;  %v1528_v6 = vld [vmem:[#allocation4 + $0x290] sm:$0xff]  ;;  %v1529_v7 = vld [vmem:[#allocation4 + $0x298] sm:$0xff] }
 0x247   :  { %2699 = vmatprep.subr.bf16.mxu1 %v2698_v27  ;;  %v2706_v24 = vpack.c.bf16 %v1529_v7, %v1528_v6 }
 0x249   :  { %2661 = vmatpush3.bf16.msra.mxu0 %v2660_v9 }
 0x24a   :  { %2663 = vmatprep.subr.bf16.mxu0 %v2662_v16  ;;  %2701 = vmatpush3.bf16.msra.mxu1 %v2700_v32  ;;  %v1563_v32 = vld [vmem:[#allocation4 + $0x3a8] sm:$0xff] }
 0x24b   :  { %2735 = vmatprep.subr.bf16.mxu1 %v2734_v36 }
 0x24d   :  { %2665 = vmatpush3.bf16.msra.mxu0 %v2664_v21 }
 0x24e   :  { %2667 = vmatprep.subr.bf16.mxu0 %v2666_v28 }
 0x251   :  { %2669 = vmatpush3.bf16.msra.mxu0 %v2668_v33 }
 0x252   :  { %2703 = vmatprep.subr.bf16.mxu0 %v2702_v39 }
 0x2e2   :  { %v484_v53 = vpop.f32.mrb[2].mxu1 }
 0x2e3   :  { %v485_v55 = vadd.f32 %v484_v53, %v320_v49  ;;  %v401_v56 = vpop.f32.mrb[2].mxu0  ;;  %v486_v2 = vpop.f32.mrb[3].mxu1  ;;  %v1510_v53 = vld [vmem:[#allocation4 + $0x200] sm:$0xff] }
 0x2e4   :  { %v402_v58 = vadd.f32 %v401_v56, %v312_v50  ;;  %v403_v59 = vpop.f32.mrb[3].mxu0  ;;  %v487_v35 = vadd.f32 %v486_v2, %v324_v14  ;;  %v1546_v56 = vld [vmem:[#allocation4 + $0x320] sm:$0xff]  ;;  %v1547_v2 = vld [vmem:[#allocation4 + $0x328] sm:$0xff] }
 0x2e5   :  { %v404_v61 = vadd.f32 %v403_v59, %v316_v52  ;;  %v3325_v62 = vsel %vm1239_vm2, %v485_v55, -1e+30  ;;  %v2742_v55 = vpack.c.bf16 %v1563_v32, %v1562_v31  ;;  %v1530_v31 = vld [vmem:[#allocation4 + $0x2a0] sm:$0xff]  ;;  %v1531_v32 = vld [vmem:[#allocation4 + $0x2a8] sm:$0xff] }
 0x2e6   :  { %1742 = vmax.xlane.f32.xlu1 %v3325_v62  ;;  %v3330_v63 = vsel %vm1239_vm2, %v402_v58, -1e+30  ;;  %v732_v0 = vpop.f32.mrb[4].mxu1 }
 0x2e7   :  { %v407_v3 = vpop.f32.mrb[4].mxu0  ;;  %1244 = vmax.xlane.f32.xlu0 %v3330_v63  ;;  %v733_v4 = vadd.f32 %v732_v0, %v520_v57  ;;  %v734_v5 = vpop.f32.mrb[5].mxu1  ;;  %v3337_v16 = vsel %vm1239_vm2, %v404_v61, -1e+30  ;;  %v1564_v61 = vld [vmem:[#allocation4 + $0x3b0] sm:$0xff]  ;;  %v1565_v0 = vld [vmem:[#allocation4 + $0x3b8] sm:$0xff] }
 0x2e8   :  { %v408_v8 = vadd.f32 %v407_v3, %v312_v50  ;;  %v409_v9 = vpop.f32.mrb[5].mxu0  ;;  %v735_v10 = vadd.f32 %v734_v5, %v524_v60  ;;  %v3369_v5 = vsel %vm1239_vm2, %v487_v35, -1e+30 }
 0x2e9   :  { %v410_v15 = vadd.f32 %v409_v9, %v316_v52  ;;  %v1207_v17 = vmax.f32 %v733_v4, 0.0 }
 0x2ea   :  { %1491 = vmax.xlane.f32.xlu1 %v3337_v16  ;;  %v3342_v18 = vsel %vm1239_vm2, %v408_v8, -1e+30  ;;  %v1208_v19 = vmax.f32 %v735_v10, 0.0  ;;  %v738_v21 = vpop.f32.mrb[6].mxu1  ;;  %v531_v8 = vsub.s32 5, %v3280_v42  ;;  %v2744_v10 = vpack.c.bf16 %v1547_v2, %v1546_v56 }
 0x2eb   :  { %v478_v22 = vpop.f32.mrb[6].mxu0  ;;  %1246 = vmax.xlane.f32.xlu0 %v3342_v18  ;;  %v739_v26 = vadd.f32 %v738_v21, %v520_v57  ;;  %v740_v27 = vpop.f32.mrb[7].mxu1  ;;  %v3354_v36 = vsel %vm1239_vm2, %v410_v15, -1e+30  ;;  %v1549_v21 = vld [vmem:[#allocation4 + $0x338] sm:$0xff] }
 0x2ec   :  { %v479_v28 = vadd.f32 %v478_v22, %v320_v49  ;;  %v480_v29 = vpop.f32.mrb[7].mxu0  ;;  %1472 = vmatprep.mubr.f32.mxu1 %v1208_v19  ;;  %v741_v33 = vadd.f32 %v740_v27, %v524_v60  ;;  %v1511_v60 = vld [vmem:[#allocation4 + $0x208] sm:$0xff]  ;;  %v2746_v19 = vpack.c.bf16 %v1565_v0, %v1564_v61  ;;  %v3385_v35 = vrot.slane %v3312_v51, %v531_v8  ;;  %v1532_v0 = vld [vmem:[#allocation4 + $0x2b0] sm:$0xff] }
 0x2ed   :  { %1473 = vmatmul.mubr.f32.vlgmr.msra.gmra.mrb[20].mxu1 %v1207_v17  ;;  %v1223_v38 = vmax.f32 %v739_v26, 0.0  ;;  %v481_v39 = vadd.f32 %v480_v29, %v324_v14  ;;  %v2704_v15 = vpack.c.bf16 %v1511_v60, %v1510_v53  ;;  %v1512_v17 = vld [vmem:[#allocation4 + $0x210] sm:$0xff]  ;;  %v1566_v26 = vld [vmem:[#allocation4 + $0x3c0] sm:$0xff]  ;;  %v1567_v27 = vld [vmem:[#allocation4 + $0x3c8] sm:$0xff] }
 0x2ee   :  { %1493 = vmax.xlane.f32.xlu1 %v3354_v36  ;;  %v3361_v41 = vsel %vm1239_vm2, %v479_v28, -1e+30  ;;  %2737 = vmatpush3.bf16.msra.mxu1 %v2736_v20  ;;  %v1224_v49 = vmax.f32 %v741_v33, 0.0  ;;  %v3363_v50 = vpop.f32.mrb[8].mxu1  ;;  %v1548_v20 = vld [vmem:[#allocation4 + $0x330] sm:$0xff]  ;;  %v1550_v53 = vld [vmem:[#allocation4 + $0x340] sm:$0xff] }
 0x2ef   :  { %v655_v52 = vpop.f32.mrb[8].mxu0  ;;  %1740 = vmax.xlane.f32.xlu0 %v3361_v41  ;;  %2739 = vmatprep.subr.bf16.mxu1 %v2738_v23  ;;  %v888_v57 = vpop.f32.mrb[9].mxu1  ;;  %v3375_v9 = vsel %vm1239_vm2, %v481_v39, -1e+30  ;;  %v1569_v60 = vld [vmem:[#allocation4 + $0x3d8] sm:$0xff] }
 0x2f0   :  { %v656_v58 = vadd.f32 %v655_v52, %v512_v30  ;;  %v657_v59 = vpop.f32.mrb[9].mxu0  ;;  %v889_v3 = vadd.f32 %v888_v57, %v3350_v34  ;;  %1477 = vmatprep.mubr.f32.mxu1 %v1224_v49  ;;  %3547 = vst [vmem:[#allocation13_spill] sm:$0xff] %v3375_v9  ;;  %v2708_v49 = vpack.c.bf16 %v1513_v25, %v1512_v17  ;;  %v1552_v17 = vld [vmem:[#allocation4 + $0x350] sm:$0xff]  ;;  %v1517_v25 = vld [vmem:[#allocation4 + $0x238] sm:$0xff] }
 0x2f1   :  { %v658_v4 = vadd.f32 %v657_v59, %v516_v37  ;;  %1478 = vmatmul.mubr.f32.gmra.mrb[22].mxu1 %v1223_v38  ;;  %v2748_v38 = vpack.c.bf16 %v1549_v21, %v1548_v20  ;;  %v2750_v52 = vpack.c.bf16 %v1567_v27, %v1566_v26  ;;  %v2710_v57 = vpack.c.bf16 %v1531_v32, %v1530_v31  ;;  %v1568_v59 = vld [vmem:[#allocation4 + $0x3d0] sm:$0xff]  ;;  %v1570_v26 = vld [vmem:[#allocation4 + $0x3e0] sm:$0xff]  ;;  %v1571_v27 = vld [vmem:[#allocation4 + $0x3e8] sm:$0xff] }
 0x2f2   :  { %1991 = vmax.xlane.f32.xlu1 %v3369_v5  ;;  %2741 = vmatpush3.bf16.msra.mxu1 %v2740_v1  ;;  %v1212_v11 = vmax.f32 %v889_v3, 0.0  ;;  %v3377_v12 = vpop.f32.mrb[10].mxu1  ;;  %v1205_v48 = vmax.f32 %v656_v58, 0.0  ;;  %v1515_v58 = vld [vmem:[#allocation4 + $0x228] sm:$0xff]  ;;  %v1533_v3 = vld [vmem:[#allocation4 + $0x2b8] sm:$0xff] }
 0x2f3   :  { %v1206_v14 = vmax.f32 %v658_v4, 0.0  ;;  %1989 = vmax.xlane.f32.xlu0 %v3375_v9  ;;  %2743 = vmatprep.subr.bf16.mxu1 %v2742_v55  ;;  %v661_v22 = vpop.f32.mrb[10].mxu0  ;;  %v3380_v23 = vpop.f32.mrb[11].mxu1  ;;  %v1551_v55 = vld [vmem:[#allocation4 + $0x348] sm:$0xff]  ;;  %v535_v4 = vsub.s32 6, %v3280_v42 }
 0x2f4   :  { %v662_v28 = vadd.f32 %v661_v22, %v512_v30  ;;  %v663_v29 = vpop.f32.mrb[11].mxu0  ;;  %1721 = vmatprep.mubr.f32.mxu1 %v1212_v11  ;;  %v1514_v30 = vld [vmem:[#allocation4 + $0x220] sm:$0xff]  ;;  %v2752_v7 = vpack.c.bf16 %v1551_v55, %v1550_v53  ;;  %v1535_v31 = vld [vmem:[#allocation4 + $0x2c8] sm:$0xff] }
 0x2f5   :  { %1397 = vmatprep.mubr.f32.mxu0 %v1206_v14  ;;  %v664_v33 = vadd.f32 %v663_v29, %v516_v37  ;;  %v2712_v11 = vpack.c.bf16 %v1515_v58, %v1514_v30  ;;  %v1516_v14 = vld [vmem:[#allocation4 + $0x230] sm:$0xff]  ;;  %v1534_v29 = vld [vmem:[#allocation4 + $0x2c0] sm:$0xff]  ;;  %v1519_v58 = vld [vmem:[#allocation4 + $0x248] sm:$0xff] }
 0x2f6   :  { %1398 = vmatmul.mubr.f32.vlgmr.msra.gmra.mrb[24].mxu0 %v1205_v48  ;;  %2745 = vmatpush3.bf16.msra.mxu1 %v2744_v10  ;;  %v1221_v39 = vmax.f32 %v662_v28, 0.0  ;;  %v3387_v1 = vpop.f32.mrb[12].mxu1  ;;  %v568_v48 = vrot.slane %v3286_v44, %v535_v4  ;;  %v1554_v30 = vld [vmem:[#allocation4 + $0x360] sm:$0xff]  ;;  %v1812_v9 = vld [vmem:[#allocation4 + $0x5a8] sm:$0xff] }
 0x2f7   :  { %2705 = vmatpush3.bf16.msra.mxu0 %v2704_v15  ;;  %2747 = vmatprep.subr.bf16.mxu1 %v2746_v19  ;;  %v1222_v56 = vmax.f32 %v664_v33, 0.0  ;;  %v3389_v37 = vpop.f32.mrb[12].mxu0  ;;  %v3391_v2 = vpop.f32.mrb[13].mxu1  ;;  %v2754_v15 = vpack.c.bf16 %v1569_v60, %v1568_v59  ;;  %v1553_v19 = vld [vmem:[#allocation4 + $0x358] sm:$0xff]  ;;  %v1572_v59 = vld [vmem:[#allocation4 + $0x3f0] sm:$0xff] }
 0x2f8   :  { %2707 = vmatprep.subr.bf16.mxu0 %v2706_v24  ;;  %v811_v61 = vpop.f32.mrb[13].mxu0  ;;  %v2714_v24 = vpack.c.bf16 %v1533_v3, %v1532_v0  ;;  %v2756_v32 = vpack.c.bf16 %v1553_v19, %v1552_v17  ;;  %v1573_v60 = vld [vmem:[#allocation4 + $0x3f8] sm:$0xff]  ;;  %v1536_v0 = vld [vmem:[#allocation4 + $0x2d0] sm:$0xff] }
 0x2f9   :  { %1402 = vmatprep.mubr.f32.mxu0 %v1222_v56  ;;  %v812_v6 = vadd.f32 %v811_v61, %v3385_v35  ;;  %v1537_v3 = vld [vmem:[#allocation4 + $0x2d8] sm:$0xff]  ;;  %v2762_v17 = vpack.c.bf16 %v1573_v60, %v1572_v59  ;;  %v1556_v19 = vld [vmem:[#allocation4 + $0x370] sm:$0xff]  ;;  %v1791_v60 = vld [vmem:[#allocation4 + $0x500] sm:$0xff] }
 0x2fa   :  { %2749 = vmatpush3.bf16.msra.mxu1 %v2748_v38  ;;  %1403 = vmatmul.mubr.f32.gmra.mrb[26].mxu0 %v1221_v39  ;;  %v3395_v10 = vpop.f32.mrb[14].mxu1  ;;  %v2716_v38 = vpack.c.bf16 %v1517_v25, %v1516_v14  ;;  %v1518_v39 = vld [vmem:[#allocation4 + $0x240] sm:$0xff] }
 0x2fb   :  { %2709 = vmatpush3.bf16.msra.mxu0 %v2708_v49  ;;  %2751 = vmatprep.subr.bf16.mxu1 %v2750_v52  ;;  %v1210_v20 = vmax.f32 %v812_v6, 0.0  ;;  %v3397_v21 = vpop.f32.mrb[14].mxu0  ;;  %v3399_v22 = vpop.f32.mrb[15].mxu1  ;;  %v2758_v49 = vpack.c.bf16 %v1571_v27, %v1570_v26  ;;  %v1555_v52 = vld [vmem:[#allocation4 + $0x368] sm:$0xff]  ;;  %v536_v6 = vrot.slane %v3312_v51, %v535_v4  ;;  %v2720_v14 = vpack.c.bf16 %v1519_v58, %v1518_v39  ;;  %v1807_v4 = vld [vmem:[#allocation4 + $0x580] sm:$0xff] }
 0x2fc   :  { %2711 = vmatprep.subr.bf16.mxu0 %v2710_v57  ;;  %v3402_v28 = vpop.f32.mrb[15].mxu0  ;;  %v2718_v57 = vpack.c.bf16 %v1535_v31, %v1534_v29  ;;  %v2722_v27 = vpack.c.bf16 %v1537_v3, %v1536_v0  ;;  %v1521_v29 = vld [vmem:[#allocation4 + $0x258] sm:$0xff]  ;;  %v1808_v31 = vld [vmem:[#allocation4 + $0x588] sm:$0xff]  ;;  %v1522_v58 = vld [vmem:[#allocation4 + $0x260] sm:$0xff] }
 0x2fd   :  { %1646 = vmatprep.mubr.f32.mxu0 %v1210_v20  ;;  %v1557_v20 = vld [vmem:[#allocation4 + $0x378] sm:$0xff]  ;;  %v887_v39 = vadd.f32 %v3363_v50, %v536_v6  ;;  %v2798_v59 = vpack.c.bf16 %v1808_v31, %v1807_v4  ;;  %v1792_v50 = vld [vmem:[#allocation4 + $0x508] sm:$0xff] }
 0x2fe   :  { %2753 = vmatpush3.bf16.msra.mxu1 %v2752_v7  ;;  %v1194_v33 = vpop.f32.mrb[16].mxu1  ;;  %v2760_v7 = vpack.c.bf16 %v1555_v52, %v1554_v30  ;;  %v895_v30 = vadd.f32 %v3380_v23, %v3350_v34  ;;  %v3429_v52 = vrot.slane %v3286_v44, %v3316_v54  ;;  %v1540_v54 = vld [vmem:[#allocation4 + $0x2f0] sm:$0xff] }
 0x2ff   :  { %2713 = vmatpush3.bf16.msra.mxu0 %v2712_v11  ;;  %2755 = vmatprep.subr.bf16.mxu1 %v2754_v15  ;;  %v3404_v53 = vpop.f32.mrb[16].mxu0  ;;  %v3406_v55 = vadd.f32 %v1194_v33, %v568_v48  ;;  %v3408_v56 = vpop.f32.mrb[17].mxu1  ;;  %v1520_v15 = vld [vmem:[#allocation4 + $0x250] sm:$0xff]  ;;  %v1538_v33 = vld [vmem:[#allocation4 + $0x2e0] sm:$0xff]  ;;  %v1211_v23 = vmax.f32 %v887_v39, 0.0 }
 0x300   :  { %2715 = vmatprep.subr.bf16.mxu0 %v2714_v24  ;;  %v3410_v61 = vpop.f32.mrb[17].mxu0  ;;  %v1043_v4 = vadd.f32 %v3391_v2, %v3429_v52  ;;  %v1793_v39 = vld [vmem:[#allocation4 + $0x510] sm:$0xff]  ;;  %v1776_v2 = vld [vmem:[#allocation4 + $0x488] sm:$0xff] }
 0x302   :  { %2757 = vmatpush3.bf16.msra.mxu1 %v2756_v32  ;;  %v1200_v11 = vpop.f32.mrb[18].mxu1 }
 0x303   :  { %2717 = vmatpush3.bf16.msra.mxu0 %v2716_v38  ;;  %2759 = vmatprep.subr.bf16.mxu1 %v2758_v49  ;;  %v3413_v24 = vpop.f32.mrb[18].mxu0  ;;  %v3415_v25 = vadd.f32 %v1200_v11, %v568_v48  ;;  %v3417_v26 = vpop.f32.mrb[19].mxu1  ;;  %v1539_v38 = vld [vmem:[#allocation4 + $0x2e8] sm:$0xff]  ;;  %v564_v49 = vrot.slane %v3286_v44, %v531_v8  ;;  %v2764_v48 = vpack.c.bf16 %v1557_v20, %v1556_v19  ;;  %v1810_v11 = vld [vmem:[#allocation4 + $0x598] sm:$0xff] }
 0x304   :  { %2719 = vmatprep.subr.bf16.mxu0 %v2718_v57  ;;  %v3419_v32 = vpop.f32.mrb[19].mxu0  ;;  %v2724_v57 = vpack.c.bf16 %v1521_v29, %v1520_v15  ;;  %v2726_v3 = vpack.c.bf16 %v1539_v38, %v1538_v33  ;;  %v1523_v8 = vld [vmem:[#allocation4 + $0x268] sm:$0xff]  ;;  %v1541_v20 = vld [vmem:[#allocation4 + $0x2f8] sm:$0xff]  ;;  %v1228_v29 = vmax.f32 %v895_v30, 0.0  ;;  %v1524_v33 = vld [vmem:[#allocation4 + $0x270] sm:$0xff] }
 0x305   :  { %v2728_v31 = vpack.c.bf16 %v1523_v8, %v1522_v58  ;;  %v2806_v8 = vpack.c.bf16 %v1812_v9, %v1811_v13 }
 0x306   :  { %2761 = vmatpush3.bf16.msra.mxu1 %v2760_v7  ;;  %v1809_v7 = vld [vmem:[#allocation4 + $0x590] sm:$0xff] }
 0x307   :  { %2721 = vmatpush3.bf16.msra.mxu0 %v2720_v14  ;;  %2763 = vmatprep.subr.bf16.mxu1 %v2762_v17  ;;  %v1117_v0 = vpop.f32.mrb[20].mxu0  ;;  %v893_v14 = vadd.f32 %v3377_v12, %v536_v6  ;;  %v528_v17 = vrot.slane %v3312_v51, %v527_v43  ;;  %v2802_v38 = vpack.c.bf16 %v1810_v11, %v1809_v7  ;;  %v1796_v7 = vld [vmem:[#allocation4 + $0x528] sm:$0xff] }
 0x308   :  { %2723 = vmatprep.subr.bf16.mxu0 %v2722_v27  ;;  %v3432_v19 = vadd.f32 %v1117_v0, %v3291_v45  ;;  %v1119_v34 = vpop.f32.mrb[21].mxu0  ;;  %v2800_v27 = vpack.c.bf16 %v1792_v50, %v1791_v60  ;;  %v1794_v0 = vld [vmem:[#allocation4 + $0x518] sm:$0xff]  ;;  %v2730_v6 = vpack.c.bf16 %v1541_v20, %v1540_v54  ;;  %v1216_v60 = vmax.f32 %v1043_v4, 0.0  ;;  %v1813_v54 = vld [vmem:[#allocation4 + $0x5b0] sm:$0xff] }
 0x309   :  { %v3435_v15 = vadd.f32 %v1119_v34, %v564_v49  ;;  %v1525_v34 = vld [vmem:[#allocation4 + $0x278] sm:$0xff]  ;;  %v1227_v30 = vmax.f32 %v893_v14, 0.0  ;;  %v810_v58 = vadd.f32 %v3389_v37, %v528_v17  ;;  %v3452_v37 = vrot.slane %v3286_v44, %v3303_v47  ;;  %v1777_v14 = vld [vmem:[#allocation4 + $0x490] sm:$0xff] }
 0x30a   :  { %2765 = vmatpush3.bf16.msra.mxu1 %v2764_v48  ;;  %v1775_v48 = vld [vmem:[#allocation4 + $0x480] sm:$0xff]  ;;  %v2732_v50 = vpack.c.bf16 %v1525_v34, %v1524_v33  ;;  %v1814_v20 = vld [vmem:[#allocation4 + $0x5b8] sm:$0xff]  ;;  %v816_v9 = vadd.f32 %v3397_v21, %v528_v17 }
 0x30b   :  { %2725 = vmatpush3.bf16.msra.mxu0 %v2724_v57  ;;  %2799 = vmatprep.subr.bf16.mxu1 %v2798_v59  ;;  %v1123_v12 = vpop.f32.mrb[22].mxu0  ;;  %v2804_v59 = vpack.c.bf16 %v1794_v0, %v1793_v39  ;;  %v2766_v11 = vpack.c.bf16 %v1776_v2, %v1775_v48  ;;  %v2810_v33 = vpack.c.bf16 %v1814_v20, %v1813_v54  ;;  %v1762_v47 = vld [vmem:[#allocation4 + $0x418] sm:$0xff]  ;;  %v1815_v39 = vld [vmem:[#allocation4 + $0x5c0] sm:$0xff]  ;;  %v1816_v0 = vld [vmem:[#allocation4 + $0x5c8] sm:$0xff] }
 0x30c   :  { %2727 = vmatprep.subr.bf16.mxu0 %v2726_v3  ;;  %v3443_v43 = vadd.f32 %v1123_v12, %v3291_v45  ;;  %v1125_v51 = vpop.f32.mrb[23].mxu0  ;;  %v1759_v3 = vld [vmem:[#allocation4 + $0x400] sm:$0xff]  ;;  %v1225_v17 = vmax.f32 %v816_v9, 0.0  ;;  %v1765_v54 = vld [vmem:[#allocation4 + $0x430] sm:$0xff]  ;;  %v1820_v9 = vld [vmem:[#allocation4 + $0x5e8] sm:$0xff] }
 0x30d   :  { %1722 = vmatmul.mubr.f32.vlgmr.msra.gmra.mrb[24].mxu1 %v1211_v23  ;;  %v3445_v57 = vadd.f32 %v1125_v51, %v564_v49  ;;  %v1795_v45 = vld [vmem:[#allocation4 + $0x520] sm:$0xff]  ;;  %v1760_v23 = vld [vmem:[#allocation4 + $0x408] sm:$0xff]  ;;  %v818_v49 = vadd.f32 %v3402_v28, %v3385_v35  ;;  %v1798_v35 = vld [vmem:[#allocation4 + $0x538] sm:$0xff] }
 0x30e   :  { %2801 = vmatpush3.bf16.msra.mxu1 %v2800_v27  ;;  %1726 = vmatprep.mubr.f32.mxu1 %v1228_v29  ;;  %v1778_v27 = vld [vmem:[#allocation4 + $0x498] sm:$0xff]  ;;  %v1209_v29 = vmax.f32 %v810_v58, 0.0  ;;  %v2808_v13 = vpack.c.bf16 %v1796_v7, %v1795_v45  ;;  %v2768_v4 = vpack.c.bf16 %v1760_v23, %v1759_v3  ;;  %v1779_v34 = vld [vmem:[#allocation4 + $0x4a0] sm:$0xff]  ;;  %v1780_v51 = vld [vmem:[#allocation4 + $0x4a8] sm:$0xff] }
 0x30f   :  { %2729 = vmatpush3.bf16.msra.mxu0 %v2728_v31  ;;  %2803 = vmatprep.subr.bf16.mxu1 %v2802_v38  ;;  %v1761_v31 = vld [vmem:[#allocation4 + $0x410] sm:$0xff]  ;;  %v2770_v28 = vpack.c.bf16 %v1778_v27, %v1777_v14  ;;  %v1226_v12 = vmax.f32 %v818_v49, 0.0  ;;  %v1763_v2 = vld [vmem:[#allocation4 + $0x420] sm:$0xff]  ;;  %v1782_v7 = vld [vmem:[#allocation4 + $0x4b8] sm:$0xff] }
 0x310   :  { %2731 = vmatprep.subr.bf16.mxu0 %v2730_v6  ;;  %v1797_v38 = vld [vmem:[#allocation4 + $0x530] sm:$0xff]  ;;  %v966_v6 = vadd.f32 %v3410_v61, %v3452_v37  ;;  %v2772_v48 = vpack.c.bf16 %v1762_v47, %v1761_v31  ;;  %v1799_v58 = vld [vmem:[#allocation4 + $0x540] sm:$0xff]  ;;  %v1802_v14 = vld [vmem:[#allocation4 + $0x558] sm:$0xff] }
 0x311   :  { %1727 = vmatmul.mubr.f32.gmra.mrb[26].mxu1 %v1227_v30  ;;  %v2812_v21 = vpack.c.bf16 %v1798_v35, %v1797_v38  ;;  %v2814_v30 = vpack.c.bf16 %v1816_v0, %v1815_v39  ;;  %v1817_v3 = vld [vmem:[#allocation4 + $0x5d0] sm:$0xff]  ;;  %v1784_v31 = vld [vmem:[#allocation4 + $0x4c8] sm:$0xff]  ;;  %v1767_v35 = vld [vmem:[#allocation4 + $0x440] sm:$0xff] }
 0x312   :  { %2805 = vmatpush3.bf16.msra.mxu1 %v2804_v59  ;;  %1970 = vmatprep.mubr.f32.mxu1 %v1216_v60  ;;  %v1800_v59 = vld [vmem:[#allocation4 + $0x548] sm:$0xff]  ;;  %v2774_v60 = vpack.c.bf16 %v1780_v51, %v1779_v34  ;;  %v1214_v61 = vmax.f32 %v966_v6, 0.0  ;;  %v1781_v45 = vld [vmem:[#allocation4 + $0x4b0] sm:$0xff]  ;;  %v1803_v47 = vld [vmem:[#allocation4 + $0x560] sm:$0xff] }
 0x313   :  { %2733 = vmatpush3.bf16.msra.mxu0 %v2732_v50  ;;  %2807 = vmatprep.subr.bf16.mxu1 %v2806_v8  ;;  %v1764_v50 = vld [vmem:[#allocation4 + $0x428] sm:$0xff]  ;;  %v1818_v8 = vld [vmem:[#allocation4 + $0x5d8] sm:$0xff]  ;;  %v1801_v49 = vld [vmem:[#allocation4 + $0x550] sm:$0xff]  ;;  %v2778_v27 = vpack.c.bf16 %v1782_v7, %v1781_v45 }
 0x314   :  { %2767 = vmatprep.subr.bf16.mxu0 %v2766_v11  ;;  %v2816_v11 = vpack.c.bf16 %v1800_v59, %v1799_v58  ;;  %v2776_v23 = vpack.c.bf16 %v1764_v50, %v1763_v2  ;;  %v2818_v20 = vpack.c.bf16 %v1818_v8, %v1817_v3  ;;  %v1804_v39 = vld [vmem:[#allocation4 + $0x568] sm:$0xff]  ;;  %v1821_v6 = vld [vmem:[#allocation4 + $0x5f0] sm:$0xff]  ;;  %v1822_v34 = vld [vmem:[#allocation4 + $0x5f8] sm:$0xff] }
 0x315   :  { %v1785_v51 = vld [vmem:[#allocation4 + $0x4d0] sm:$0xff]  ;;  %v2826_v58 = vpack.c.bf16 %v1822_v34, %v1821_v6  ;;  %v1770_v3 = vld [vmem:[#allocation4 + $0x458] sm:$0xff]  ;;  %v2056_v8 = vld [vmem:[#allocation4 + $0x780] sm:$0xff] }
 0x316   :  { %1647 = vmatmul.mubr.f32.vlgmr.msra.gmra.mrb[28].mxu0 %v1209_v29  ;;  %2809 = vmatpush3.bf16.msra.mxu1 %v2808_v13  ;;  %v1766_v29 = vld [vmem:[#allocation4 + $0x438] sm:$0xff]  ;;  %v1819_v13 = vld [vmem:[#allocation4 + $0x5e0] sm:$0xff]  ;;  %v1805_v59 = vld [vmem:[#allocation4 + $0x570] sm:$0xff] }
 0x317   :  { %2769 = vmatpush3.bf16.msra.mxu0 %v2768_v4  ;;  %2811 = vmatprep.subr.bf16.mxu1 %v2810_v33  ;;  %v1783_v4 = vld [vmem:[#allocation4 + $0x4c0] sm:$0xff]  ;;  %v2820_v33 = vpack.c.bf16 %v1802_v14, %v1801_v49  ;;  %v2780_v38 = vpack.c.bf16 %v1766_v29, %v1765_v54  ;;  %v1788_v7 = vld [vmem:[#allocation4 + $0x4e8] sm:$0xff]  ;;  %v3548_v54 = vsub.s32 7, %v3280_v42  ;;  %v2042_v6 = vld [vmem:[#allocation4 + $0x710] sm:$0xff] }
 0x318   :  { %2771 = vmatprep.subr.bf16.mxu0 %v2770_v28  ;;  %1651 = vmatprep.mubr.f32.mxu0 %v1226_v12  ;;  %v2822_v28 = vpack.c.bf16 %v1820_v9, %v1819_v13  ;;  %v2782_v0 = vpack.c.bf16 %v1784_v31, %v1783_v4  ;;  %v1768_v12 = vld [vmem:[#allocation4 + $0x448] sm:$0xff]  ;;  %v1787_v45 = vld [vmem:[#allocation4 + $0x4e0] sm:$0xff]  ;;  %v2058_v4 = vld [vmem:[#allocation4 + $0x790] sm:$0xff] }
 0x319   :  { %v2784_v2 = vpack.c.bf16 %v1768_v12, %v1767_v35  ;;  %v1771_v14 = vld [vmem:[#allocation4 + $0x460] sm:$0xff]  ;;  %v2041_v13 = vld [vmem:[#allocation4 + $0x708] sm:$0xff]  ;;  %v2790_v9 = vpack.c.bf16 %v1788_v7, %v1787_v45  ;;  %v2059_v31 = vld [vmem:[#allocation4 + $0x798] sm:$0xff]  ;;  %v972_v45 = vadd.f32 %v3419_v32, %v3452_v37 }
 0x31a   :  { %2813 = vmatpush3.bf16.msra.mxu1 %v2812_v21  ;;  %1652 = vmatmul.mubr.f32.gmra.mrb[30].mxu0 %v1225_v17  ;;  %v1786_v21 = vld [vmem:[#allocation4 + $0x4d8] sm:$0xff]  ;;  %v552_v17 = vrot.slane %v3286_v44, %v3294_v46  ;;  %v2040_v29 = vld [vmem:[#allocation4 + $0x700] sm:$0xff]  ;;  %v2866_v12 = vpack.c.bf16 %v2059_v31, %v2058_v4  ;;  %v2062_v7 = vld [vmem:[#allocation4 + $0x7b0] sm:$0xff] }
 0x31b   :  { %2773 = vmatpush3.bf16.msra.mxu0 %v2772_v48  ;;  %2815 = vmatprep.subr.bf16.mxu1 %v2814_v30  ;;  %v2824_v48 = vpack.c.bf16 %v1804_v39, %v1803_v47  ;;  %v1769_v30 = vld [vmem:[#allocation4 + $0x450] sm:$0xff]  ;;  %v2786_v50 = vpack.c.bf16 %v1786_v21, %v1785_v51  ;;  %v2864_v35 = vpack.c.bf16 %v2041_v13, %v2040_v29  ;;  %v2043_v34 = vld [vmem:[#allocation4 + $0x718] sm:$0xff]  ;;  %v2064_v4 = vld [vmem:[#allocation4 + $0x7c0] sm:$0xff] }
 0x31c   :  { %2775 = vmatprep.subr.bf16.mxu0 %v2774_v60  ;;  %1895 = vmatprep.mubr.f32.mxu0 %v1214_v61  ;;  %v1806_v60 = vld [vmem:[#allocation4 + $0x578] sm:$0xff]  ;;  %v2057_v61 = vld [vmem:[#allocation4 + $0x788] sm:$0xff]  ;;  %v2788_v49 = vpack.c.bf16 %v1770_v3, %v1769_v30  ;;  %v1047_v42 = vadd.f32 %v3395_v10, %v552_v17  ;;  %v2060_v10 = vld [vmem:[#allocation4 + $0x7a0] sm:$0xff] }
 0x31d   :  { %v2828_v46 = vpack.c.bf16 %v1806_v60, %v1805_v59  ;;  %v1774_v21 = vld [vmem:[#allocation4 + $0x478] sm:$0xff]  ;;  %v2008_v59 = vld [vmem:[#allocation4 + $0x600] sm:$0xff]  ;;  %v2045_v3 = vld [vmem:[#allocation4 + $0x728] sm:$0xff] }
 0x31e   :  { %2817 = vmatpush3.bf16.msra.mxu1 %v2816_v11  ;;  %v1041_v11 = vadd.f32 %v3387_v1, %v552_v17  ;;  %v1772_v1 = vld [vmem:[#allocation4 + $0x468] sm:$0xff]  ;;  %v2046_v13 = vld [vmem:[#allocation4 + $0x730] sm:$0xff]  ;;  %v2011_v37 = vld [vmem:[#allocation4 + $0x618] sm:$0xff] }
 0x31f   :  { %2777 = vmatpush3.bf16.msra.mxu0 %v2776_v23  ;;  %2819 = vmatprep.subr.bf16.mxu1 %v2818_v20  ;;  %v1049_v23 = vadd.f32 %v3399_v22, %v3429_v52  ;;  %v3465_v20 = vrot.slane %v3286_v44, %v3548_v54  ;;  %v1790_v22 = vld [vmem:[#allocation4 + $0x4f8] sm:$0xff]  ;;  %v544_v52 = vrot.slane %v3286_v44, %v3300_v40  ;;  %v2061_v17 = vld [vmem:[#allocation4 + $0x7a8] sm:$0xff]  ;;  %v2024_v44 = vld [vmem:[#allocation4 + $0x680] sm:$0xff] }
 0x320   :  { %2779 = vmatprep.subr.bf16.mxu0 %v2778_v27  ;;  %v2862_v27 = vpack.c.bf16 %v2057_v61, %v2056_v8  ;;  %v2792_v39 = vpack.c.bf16 %v1772_v1, %v1771_v14  ;;  %v2025_v40 = vld [vmem:[#allocation4 + $0x688] sm:$0xff]  ;;  %v2870_v60 = vpack.c.bf16 %v2061_v17, %v2060_v10  ;;  %v1230_v1 = vmax.f32 %v972_v45, 0.0  ;;  %v2052_v45 = vld [vmem:[#allocation4 + $0x760] sm:$0xff] }
 0x321   :  { %v1197_v47 = vadd.f32 %v3408_v56, %v3465_v20  ;;  %v2868_v56 = vpack.c.bf16 %v2043_v34, %v2042_v6  ;;  %v2830_v8 = vpack.c.bf16 %v2025_v40, %v2024_v44  ;;  %v2009_v61 = vld [vmem:[#allocation4 + $0x608] sm:$0xff]  ;;  %v970_v54 = vadd.f32 %v3413_v24, %v544_v52  ;;  %v2067_v6 = vld [vmem:[#allocation4 + $0x7d8] sm:$0xff]  ;;  %v2014_v44 = vld [vmem:[#allocation4 + $0x630] sm:$0xff] }
 0x322   :  { %2821 = vmatpush3.bf16.msra.mxu1 %v2820_v33  ;;  %v1215_v33 = vmax.f32 %v1041_v11, 0.0  ;;  %v2063_v11 = vld [vmem:[#allocation4 + $0x7b8] sm:$0xff]  ;;  %v2832_v14 = vpack.c.bf16 %v2009_v61, %v2008_v59  ;;  %v2065_v31 = vld [vmem:[#allocation4 + $0x7c8] sm:$0xff]  ;;  %v1218_v34 = vmax.f32 %v3435_v15, 0.0 }
 0x323   :  { %2781 = vmatpush3.bf16.msra.mxu0 %v2780_v38  ;;  %2823 = vmatprep.subr.bf16.mxu1 %v2822_v28  ;;  %v1789_v38 = vld [vmem:[#allocation4 + $0x4f0] sm:$0xff]  ;;  %v1232_v28 = vmax.f32 %v1049_v23, 0.0  ;;  %v1220_v30 = vmax.f32 %v1197_v47, 0.0  ;;  %v2874_v29 = vpack.c.bf16 %v2063_v11, %v2062_v7  ;;  %v2049_v47 = vld [vmem:[#allocation4 + $0x748] sm:$0xff] }
 0x324   :  { %2783 = vmatprep.subr.bf16.mxu0 %v2782_v0  ;;  %v1773_v0 = vld [vmem:[#allocation4 + $0x470] sm:$0xff]  ;;  %v2794_v51 = vpack.c.bf16 %v1790_v22, %v1789_v38  ;;  %v2029_v38 = vld [vmem:[#allocation4 + $0x6a8] sm:$0xff]  ;;  %v1229_v22 = vmax.f32 %v970_v54, 0.0 }
 0x325   :  { %v2069_v59 = vld [vmem:[#allocation4 + $0x7e8] sm:$0xff]  ;;  %v2034_v54 = vld [vmem:[#allocation4 + $0x6d0] sm:$0xff] }
 0x326   :  { %2825 = vmatpush3.bf16.msra.mxu1 %v2824_v48  ;;  %v1231_v48 = vmax.f32 %v1047_v42, 0.0  ;;  %v2033_v15 = vld [vmem:[#allocation4 + $0x6c8] sm:$0xff] }
 0x327   :  { %2785 = vmatpush3.bf16.msra.mxu0 %v2784_v2  ;;  %2827 = vmatprep.subr.bf16.mxu1 %v2826_v58  ;;  %v964_v2 = vadd.f32 %v3404_v53, %v544_v52  ;;  %v2796_v58 = vpack.c.bf16 %v1774_v21, %v1773_v0  ;;  %v2026_v53 = vld [vmem:[#allocation4 + $0x690] sm:$0xff]  ;;  %v2012_v52 = vld [vmem:[#allocation4 + $0x620] sm:$0xff]  ;;  %v2013_v0 = vld [vmem:[#allocation4 + $0x628] sm:$0xff] }
 0x328   :  { %2787 = vmatprep.subr.bf16.mxu0 %v2786_v50  ;;  %v2044_v50 = vld [vmem:[#allocation4 + $0x720] sm:$0xff]  ;;  %v2031_v21 = vld [vmem:[#allocation4 + $0x6b8] sm:$0xff]  ;;  %v2840_v17 = vpack.c.bf16 %v2013_v0, %v2012_v52  ;;  %v2053_v7 = vld [vmem:[#allocation4 + $0x768] sm:$0xff] }
 0x329   :  { %v1213_v23 = vmax.f32 %v964_v2, 0.0  ;;  %v2051_v2 = vld [vmem:[#allocation4 + $0x758] sm:$0xff]  ;;  %v2021_v52 = vld [vmem:[#allocation4 + $0x668] sm:$0xff] }
 0x32a   :  { %2829 = vmatpush3.bf16.msra.mxu1 %v2828_v46  ;;  %v2027_v46 = vld [vmem:[#allocation4 + $0x698] sm:$0xff] }
 0x32b   :  { %2789 = vmatpush3.bf16.msra.mxu0 %v2788_v49  ;;  %2863 = vmatprep.subr.bf16.mxu1 %v2862_v27  ;;  %v2872_v49 = vpack.c.bf16 %v2045_v3, %v2044_v50  ;;  %v2010_v27 = vld [vmem:[#allocation4 + $0x610] sm:$0xff]  ;;  %v2834_v32 = vpack.c.bf16 %v2027_v46, %v2026_v53  ;;  %v2017_v53 = vld [vmem:[#allocation4 + $0x648] sm:$0xff] }
 0x32c   :  { %2791 = vmatprep.subr.bf16.mxu0 %v2790_v9  ;;  %v2047_v9 = vld [vmem:[#allocation4 + $0x738] sm:$0xff]  ;;  %v2836_v42 = vpack.c.bf16 %v2011_v37, %v2010_v27  ;;  %v2070_v46 = vld [vmem:[#allocation4 + $0x7f0] sm:$0xff] }
 0x32d   :  { %1971 = vmatmul.mubr.f32.vlgmr.msra.gmra.mrb[28].mxu1 %v1215_v33  ;;  %v2028_v33 = vld [vmem:[#allocation4 + $0x6a0] sm:$0xff]  ;;  %v2876_v24 = vpack.c.bf16 %v2047_v9, %v2046_v13  ;;  %v2054_v13 = vld [vmem:[#allocation4 + $0x770] sm:$0xff]  ;;  %v2055_v9 = vld [vmem:[#allocation4 + $0x778] sm:$0xff] }
 0x32e   :  { %2865 = vmatpush3.bf16.msra.mxu1 %v2864_v35  ;;  %1975 = vmatprep.mubr.f32.mxu1 %v1232_v28  ;;  %v2878_v35 = vpack.c.bf16 %v2065_v31, %v2064_v4  ;;  %v2048_v28 = vld [vmem:[#allocation4 + $0x740] sm:$0xff]  ;;  %v2018_v37 = vld [vmem:[#allocation4 + $0x650] sm:$0xff]  ;;  %v2037_v31 = vld [vmem:[#allocation4 + $0x6e8] sm:$0xff] }
 0x32f   :  { %2793 = vmatpush3.bf16.msra.mxu0 %v2792_v39  ;;  %2867 = vmatprep.subr.bf16.mxu1 %v2866_v12  ;;  %v2838_v39 = vpack.c.bf16 %v2029_v38, %v2028_v33  ;;  %v2066_v12 = vld [vmem:[#allocation4 + $0x7d0] sm:$0xff]  ;;  %v2880_v10 = vpack.c.bf16 %v2049_v47, %v2048_v28  ;;  %v2036_v4 = vld [vmem:[#allocation4 + $0x6e0] sm:$0xff]  ;;  %v2892_v33 = vpack.c.bf16 %v2055_v9, %v2054_v13  ;;  %v2039_v47 = vld [vmem:[#allocation4 + $0x6f8] sm:$0xff] }
 0x330   :  { %2795 = vmatprep.subr.bf16.mxu0 %v2794_v51  ;;  %v2030_v51 = vld [vmem:[#allocation4 + $0x6b0] sm:$0xff]  ;;  %v2882_v40 = vpack.c.bf16 %v2067_v6, %v2066_v12  ;;  %v1203_v38 = vadd.f32 %v3417_v26, %v3465_v20  ;;  %v1235_v26 = vmax.f32 %v3415_v25, 0.0 }
 0x331   :  { %1976 = vmatmul.mubr.f32.gmra.mrb[30].mxu1 %v1231_v48  ;;  %v2050_v48 = vld [vmem:[#allocation4 + $0x750] sm:$0xff] }
 0x332   :  { %2869 = vmatpush3.bf16.msra.mxu1 %v2868_v56  ;;  %2219 = vmatprep.mubr.f32.mxu1 %v1220_v30  ;;  %v2842_v56 = vpack.c.bf16 %v2031_v21, %v2030_v51  ;;  %v2015_v30 = vld [vmem:[#allocation4 + $0x638] sm:$0xff]  ;;  %v2884_v50 = vpack.c.bf16 %v2051_v2, %v2050_v48  ;;  %v2038_v28 = vld [vmem:[#allocation4 + $0x6f0] sm:$0xff]  ;;  %v1217_v51 = vmax.f32 %v3432_v19, 0.0  ;;  %v1233_v21 = vmax.f32 %v3443_v43, 0.0 }
 0x333   :  { %2797 = vmatpush3.bf16.msra.mxu0 %v2796_v58  ;;  %2871 = vmatprep.subr.bf16.mxu1 %v2870_v60  ;;  %v2068_v58 = vld [vmem:[#allocation4 + $0x7e0] sm:$0xff]  ;;  %v2844_v3 = vpack.c.bf16 %v2015_v30, %v2014_v44  ;;  %v2858_v12 = vpack.c.bf16 %v2039_v47, %v2038_v28  ;;  %v2022_v6 = vld [vmem:[#allocation4 + $0x670] sm:$0xff] }
 0x334   :  { %2831 = vmatprep.subr.bf16.mxu0 %v2830_v8  ;;  %v2032_v60 = vld [vmem:[#allocation4 + $0x6c0] sm:$0xff]  ;;  %v2886_v61 = vpack.c.bf16 %v2069_v59, %v2068_v58 }
 0x335   :  { %v2016_v8 = vld [vmem:[#allocation4 + $0x640] sm:$0xff]  ;;  %v2846_v11 = vpack.c.bf16 %v2033_v15, %v2032_v60 }
 0x336   :  { %1896 = vmatmul.mubr.f32.vlgmr.msra.gmra.mrb[32].mxu0 %v1213_v23  ;;  %2873 = vmatpush3.bf16.msra.mxu1 %v2872_v49  ;;  %v2071_v23 = vld [vmem:[#allocation4 + $0x7f8] sm:$0xff]  ;;  %v2848_v27 = vpack.c.bf16 %v2017_v53, %v2016_v8  ;;  %v3549_v8 = vld [vmem:[#allocation13_spill] sm:$0xff] }
 0x337   :  { %2833 = vmatpush3.bf16.msra.mxu0 %v2832_v14  ;;  %2875 = vmatprep.subr.bf16.mxu1 %v2874_v29  ;;  %v2035_v49 = vld [vmem:[#allocation4 + $0x6d8] sm:$0xff]  ;;  %v2888_v14 = vpack.c.bf16 %v2053_v7, %v2052_v45  ;;  %v2890_v29 = vpack.c.bf16 %v2071_v23, %v2070_v46 }
 0x338   :  { %2835 = vmatprep.subr.bf16.mxu0 %v2834_v32  ;;  %1900 = vmatprep.mubr.f32.mxu0 %v1230_v1  ;;  %v2850_v32 = vpack.c.bf16 %v2035_v49, %v2034_v54  ;;  %v2019_v1 = vld [vmem:[#allocation4 + $0x658] sm:$0xff] }
 0x33a   :  { %2877 = vmatpush3.bf16.msra.mxu1 %v2876_v24  ;;  %1901 = vmatmul.mubr.f32.gmra.mrb[34].mxu0 %v1229_v22  ;;  %v2852_v22 = vpack.c.bf16 %v2019_v1, %v2018_v37  ;;  %v2854_v24 = vpack.c.bf16 %v2037_v31, %v2036_v4 }
 0x33b   :  { %2837 = vmatpush3.bf16.msra.mxu0 %v2836_v42  ;;  %2879 = vmatprep.subr.bf16.mxu1 %v2878_v35  ;;  %v2020_v42 = vld [vmem:[#allocation4 + $0x660] sm:$0xff]  ;;  %v1219_v35 = vmax.f32 %v3406_v55, 0.0  ;;  %v1234_v55 = vmax.f32 %v3445_v57, 0.0 }
 0x33c   :  { %2839 = vmatprep.subr.bf16.mxu0 %v2838_v39  ;;  %2144 = vmatprep.mubr.f32.mxu0 %v1218_v34  ;;  %v1236_v39 = vmax.f32 %v1203_v38, 0.0  ;;  %v2856_v0 = vpack.c.bf16 %v2021_v52, %v2020_v42  ;;  %v2023_v34 = vld [vmem:[#allocation4 + $0x678] sm:$0xff] }
 0x33d   :  { %v2860_v20 = vpack.c.bf16 %v2023_v34, %v2022_v6  ;;  %v2282_v6 = vld [vmem:[#allocation6 + $0x1] ss:$0 sm:$0xff] }
 0x33e   :  { %2881 = vmatpush3.bf16.msra.mxu1 %v2880_v10 }
 0x33f   :  { %2841 = vmatpush3.bf16.msra.mxu0 %v2840_v17  ;;  %2883 = vmatprep.subr.bf16.mxu1 %v2882_v40 }
 0x340   :  { %2843 = vmatprep.subr.bf16.mxu0 %v2842_v56 }
 0x342   :  { %2885 = vmatpush3.bf16.msra.mxu1 %v2884_v50 }
 0x343   :  { %2845 = vmatpush3.bf16.msra.mxu0 %v2844_v3  ;;  %2887 = vmatprep.subr.bf16.mxu1 %v2886_v61 }
 0x344   :  { %2847 = vmatprep.subr.bf16.mxu0 %v2846_v11 }
 0x346   :  { %2889 = vmatpush3.bf16.msra.mxu1 %v2888_v14 }
 0x347   :  { %2849 = vmatpush3.bf16.msra.mxu0 %v2848_v27  ;;  %2891 = vmatprep.subr.bf16.mxu1 %v2890_v29 }
 0x348   :  { %2851 = vmatprep.subr.bf16.mxu0 %v2850_v32  ;;  %v2281_v32 = vld [vmem:[#allocation6] ss:$0 sm:$0xff] }
 0x34a   :  { %2893 = vmatpush3.bf16.msra.mxu1 %v2892_v33 }
 0x34b   :  { %2853 = vmatpush3.bf16.msra.mxu0 %v2852_v22 }
 0x34c   :  { %2855 = vmatprep.subr.bf16.mxu0 %v2854_v24 }
 0x34d   :  { %2220 = vmatmul.mubr.f32.vlgmr.msra.gmra.mrb[32].mxu1 %v1219_v35 }
 0x34e   :  { %2224 = vmatprep.mubr.f32.mxu1 %v1236_v39 }
 0x34f   :  { %2857 = vmatpush3.bf16.msra.mxu0 %v2856_v0 }
 0x350   :  { %2859 = vmatprep.subr.bf16.mxu0 %v2858_v12 }
 0x351   :  { %2225 = vmatmul.mubr.f32.gmra.mrb[34].mxu1 %v1235_v26 }
 0x353   :  { %2861 = vmatpush3.bf16.msra.mxu0 %v2860_v20 }
 0x356   :  { %2145 = vmatmul.mubr.f32.vlgmr.msra.gmra.mrb[36].mxu0 %v1217_v51 }
 0x357   :  { %2149 = vmatprep.mubr.f32.mxu0 %v1234_v55 }
 0x35a   :  { %2150 = vmatmul.mubr.f32.gmra.mrb[38].mxu0 %v1233_v21 }
 0x373   :  { %v1743_v10 = vpop.xlane.xlu1 %1742 }
 0x374   :  { %v1745_v17 = vsub.f32 %v3325_v62, %v1743_v10  ;;  %v1245_v25 = vpop.xlane.xlu0 %1244 }
 0x375   :  { %v1248_v44 = vsub.f32 %v3330_v63, %v1245_v25 }
 0x376   :  { %v1748_v40 = vmul.f32 1.442695, %v1745_v17 }
 0x377   :  { %v1250_v48 = vmul.f32 1.442695, %v1248_v44  ;;  %v1492_v2 = vpop.xlane.xlu1 %1491 }
 0x378   :  { %2910 = vpow2.f32 %v1748_v40  ;;  %v1495_v57 = vsub.f32 %v3337_v16, %v1492_v2  ;;  %v1247_v56 = vpop.xlane.xlu0 %1246 }
 0x379   :  { %2912 = vpow2.f32 %v1250_v48  ;;  %v1249_v19 = vsub.f32 %v3342_v18, %v1247_v56 }
 0x37a   :  { %v1497_v30 = vmul.f32 1.442695, %v1495_v57 }
 0x37b   :  { %v1252_v58 = vmul.f32 1.442695, %v1249_v19  ;;  %v1494_v43 = vpop.xlane.xlu1 %1493 }
 0x37c   :  { %2914 = vpow2.f32 %v1497_v30  ;;  %v1496_v59 = vsub.f32 %v3354_v36, %v1494_v43  ;;  %v1741_v62 = vpop.xlane.xlu0 %1740  ;;  %v2283_v30 = vld [vmem:[#allocation6 + $0x2] ss:$0 sm:$0xff] }
 0x37d   :  { %2916 = vpow2.f32 %v1252_v58  ;;  %v1744_v63 = vsub.f32 %v3361_v41, %v1741_v62 }
 0x37e   :  { %v1499_v60 = vmul.f32 1.442695, %v1496_v59 }
 0x37f   :  { %v1746_v15 = vmul.f32 1.442695, %v1744_v63  ;;  %v1992_v50 = vpop.xlane.xlu1 %1991 }
 0x380   :  { %2918 = vpow2.f32 %v1499_v60  ;;  %v1994_v16 = vsub.f32 %v3369_v5, %v1992_v50  ;;  %v1990_v3 = vpop.xlane.xlu0 %1989 }
 0x381   :  { %2920 = vpow2.f32 %v1746_v15  ;;  %v1993_v18 = vsub.f32 %v3549_v8, %v1990_v3 }
 0x382   :  { %v3492_v61 = vpop.eup %2910  ;;  %v1997_v45 = vmul.f32 1.442695, %v1994_v16 }
 0x383   :  { %v3494_v7 = vpop.eup %2912  ;;  %v1995_v36 = vmul.f32 1.442695, %v1993_v18  ;;  %1752 = vadd.xlane.f32.xlu1 %v3492_v61 }
 0x384   :  { %2922 = vpow2.f32 %v1997_v45  ;;  %1254 = vadd.xlane.f32.xlu0 %v3494_v7 }
 0x385   :  { %2924 = vpow2.f32 %v1995_v36 }
 0x386   :  { %v3498_v41 = vpop.eup %2914 }
 0x387   :  { %v3500_v11 = vpop.eup %2916 }
 0x388   :  { %1501 = vadd.xlane.f32.xlu0 %v3498_v41  ;;  %1256 = vadd.xlane.f32.xlu1 %v3500_v11 }
 0x38a   :  { %v3504_v5 = vpop.eup %2918 }
 0x38b   :  { %v3506_v53 = vpop.eup %2920 }
 0x38c   :  { %1503 = vadd.xlane.f32.xlu1 %v3504_v5  ;;  %1750 = vadd.xlane.f32.xlu0 %v3506_v53 }
 0x38e   :  { %v3510_v46 = vpop.eup %2922 }
 0x38f   :  { %v3512_v23 = vpop.eup %2924 }
 0x390   :  { %2001 = vadd.xlane.f32.xlu1 %v3510_v46  ;;  %1999 = vadd.xlane.f32.xlu0 %v3512_v23 }
 0x3c0   :  { %v2364_v54 = vpop.f32.mrb[20].mxu1 }
 0x3c1   :  { %v2365_v49 = vpop.f32.mrb[21].mxu1 }
 0x3c2   :  { %v2366_v14 = vadd.f32 %v2365_v49, %v2364_v54 }
 0x3c4   :  { %v2367_v27 = vpop.f32.mrb[22].mxu1 }
 0x3c5   :  { %v2368_v29 = vpop.f32.mrb[23].mxu1 }
 0x3c6   :  { %v2369_v13 = vadd.f32 %v2368_v29, %v2367_v27 }
 0x3c9   :  { %v2326_v9 = vpop.f32.mrb[24].mxu0 }
 0x3ca   :  { %v2327_v37 = vpop.f32.mrb[25].mxu0 }
 0x3cb   :  { %v2328_v1 = vadd.f32 %v2327_v37, %v2326_v9 }
 0x3cd   :  { %v1400_v4 = vadd.f32 %v2328_v1, %v2281_v32  ;;  %v2329_v31 = vpop.f32.mrb[26].mxu0 }
 0x3ce   :  { %v2330_v33 = vpop.f32.mrb[27].mxu0 }
 0x3cf   :  { %v2331_v38 = vadd.f32 %v2330_v33, %v2329_v31  ;;  %v1475_v22 = vadd.f32 %v2366_v14, %v1400_v4 }
 0x3d1   :  { %v1405_v24 = vadd.f32 %v2331_v38, %v2281_v32 }
 0x3d3   :  { %v3516_v42 = vadd.f32 %v2369_v13, %v1405_v24 }
 0x3e0   :  { %v2440_v52 = vpop.f32.mrb[24].mxu1 }
 0x3e1   :  { %v2441_v35 = vpop.f32.mrb[25].mxu1 }
 0x3e2   :  { %v2442_v28 = vadd.f32 %v2441_v35, %v2440_v52 }
 0x3e4   :  { %v2443_v47 = vpop.f32.mrb[26].mxu1 }
 0x3e5   :  { %v2444_v39 = vpop.f32.mrb[27].mxu1 }
 0x3e6   :  { %v2445_v0 = vadd.f32 %v2444_v39, %v2443_v47 }
 0x3e9   :  { %v2402_v12 = vpop.f32.mrb[28].mxu0 }
 0x3ea   :  { %v2403_v34 = vpop.f32.mrb[29].mxu0 }
 0x3eb   :  { %v2404_v26 = vadd.f32 %v2403_v34, %v2402_v12  ;;  %v2284_v34 = vld [vmem:[#allocation6 + $0x3] ss:$0 sm:$0xff] }
 0x3ed   :  { %v1649_v20 = vadd.f32 %v2404_v26, %v2282_v6  ;;  %v2405_v55 = vpop.f32.mrb[30].mxu0 }
 0x3ee   :  { %v2406_v51 = vpop.f32.mrb[31].mxu0 }
 0x3ef   :  { %v1724_v21 = vadd.f32 %v2442_v28, %v1649_v20  ;;  %v2407_v10 = vadd.f32 %v2406_v51, %v2405_v55 }
 0x3f1   :  { %v1654_v17 = vadd.f32 %v2407_v10, %v2282_v6 }
 0x3f3   :  { %v1729_v25 = vadd.f32 %v2445_v0, %v1654_v17 }
 0x400   :  { %v2516_v44 = vpop.f32.mrb[28].mxu1 }
 0x401   :  { %v2517_v40 = vpop.f32.mrb[29].mxu1 }
 0x402   :  { %v2518_v48 = vadd.f32 %v2517_v40, %v2516_v44 }
 0x404   :  { %v2519_v2 = vpop.f32.mrb[30].mxu1 }
 0x405   :  { %v2520_v57 = vpop.f32.mrb[31].mxu1 }
 0x406   :  { %v2521_v56 = vadd.f32 %v2520_v57, %v2519_v2 }
 0x409   :  { %v2478_v19 = vpop.f32.mrb[32].mxu0 }
 0x40a   :  { %v2479_v58 = vpop.f32.mrb[33].mxu0 }
 0x40b   :  { %v2480_v43 = vadd.f32 %v2479_v58, %v2478_v19 }
 0x40d   :  { %v1898_v59 = vadd.f32 %v2480_v43, %v2283_v30  ;;  %v2481_v62 = vpop.f32.mrb[34].mxu0 }
 0x40e   :  { %v2482_v63 = vpop.f32.mrb[35].mxu0 }
 0x40f   :  { %v1973_v60 = vadd.f32 %v2518_v48, %v1898_v59  ;;  %v2483_v15 = vadd.f32 %v2482_v63, %v2481_v62 }
 0x410   :  { %v1753_v50 = vpop.xlane.xlu1 %1752 }
 0x411   :  { %2926 = vrcp.f32 %v1753_v50  ;;  %v1255_v16 = vpop.xlane.xlu0 %1254  ;;  %v1903_v3 = vadd.f32 %v2483_v15, %v2283_v30 }
 0x412   :  { %2928 = vrcp.f32 %v1255_v16 }
 0x413   :  { %v1978_v8 = vadd.f32 %v2521_v56, %v1903_v3 }
 0x415   :  { %v1257_v18 = vpop.xlane.xlu1 %1256  ;;  %v1502_v45 = vpop.xlane.xlu0 %1501 }
 0x416   :  { %2930 = vrcp.f32 %v1257_v18 }
 0x417   :  { %2932 = vrcp.f32 %v1502_v45 }
 0x419   :  { %v1504_v36 = vpop.xlane.xlu1 %1503  ;;  %v1751_v54 = vpop.xlane.xlu0 %1750 }
 0x41a   :  { %2934 = vrcp.f32 %v1504_v36 }
 0x41b   :  { %v2927_v49 = vpop.eup %2926  ;;  %2936 = vrcp.f32 %v1751_v54 }
 0x41c   :  { %v2929_v14 = vpop.eup %2928  ;;  %v1757_v27 = vmul.f32 %v2927_v49, %v3492_v61 }
 0x41d   :  { %v1260_v29 = vmul.f32 %v2929_v14, %v3494_v7  ;;  %v2000_v9 = vpop.xlane.xlu0 %1999  ;;  %v2002_v52 = vpop.xlane.xlu1 %2001 }
 0x41e   :  { %v1982_v13 = vmul.f32 %v1978_v8, %v1757_v27  ;;  %2938 = vrcp.f32 %v2000_v9 }
 0x41f   :  { %v1483_v32 = vmul.f32 %v1475_v22, %v1260_v29  ;;  %2940 = vrcp.f32 %v2002_v52 }
 0x420   :  { %v2931_v37 = vpop.eup %2930  ;;  %1985 = vadd.xlane.f32.xlu1 %v1982_v13  ;;  %v2592_v1 = vpop.f32.mrb[32].mxu1 }
 0x421   :  { %v2933_v4 = vpop.eup %2932  ;;  %1485 = vadd.xlane.f32.xlu0 %v1483_v32  ;;  %v1261_v31 = vmul.f32 %v2931_v37, %v3500_v11  ;;  %v2593_v33 = vpop.f32.mrb[33].mxu1 }
 0x422   :  { %v1507_v38 = vmul.f32 %v2933_v4, %v3498_v41  ;;  %v2594_v24 = vadd.f32 %v2593_v33, %v2592_v1 }
 0x423   :  { %v1484_v61 = vmul.f32 %v3516_v42, %v1261_v31 }
 0x424   :  { %v2935_v35 = vpop.eup %2934  ;;  %v1732_v7 = vmul.f32 %v1724_v21, %v1507_v38  ;;  %v2595_v28 = vpop.f32.mrb[34].mxu1 }
 0x425   :  { %v2937_v47 = vpop.eup %2936  ;;  %1487 = vadd.xlane.f32.xlu1 %v1484_v61  ;;  %v1508_v22 = vmul.f32 %v2935_v35, %v3504_v5  ;;  %v2596_v39 = vpop.f32.mrb[35].mxu1 }
 0x426   :  { %1734 = vadd.xlane.f32.xlu0 %v1732_v7  ;;  %v1756_v11 = vmul.f32 %v2937_v47, %v3506_v53  ;;  %v2597_v0 = vadd.f32 %v2596_v39, %v2595_v28 }
 0x427   :  { %v1733_v12 = vmul.f32 %v1729_v25, %v1508_v22 }
 0x428   :  { %v1981_v6 = vmul.f32 %v1973_v60, %v1756_v11  ;;  %v2939_v20 = vpop.eup %2938 }
 0x429   :  { %v2554_v41 = vpop.f32.mrb[36].mxu0  ;;  %1736 = vadd.xlane.f32.xlu1 %v1733_v12  ;;  %v2005_v5 = vmul.f32 %v2939_v20, %v3512_v23  ;;  %v2941_v44 = vpop.eup %2940 }
 0x42a   :  { %v2555_v26 = vpop.f32.mrb[37].mxu0  ;;  %1983 = vadd.xlane.f32.xlu0 %v1981_v6  ;;  %v2006_v25 = vmul.f32 %v2941_v44, %v3510_v46 }
 0x42b   :  { %v2556_v42 = vadd.f32 %v2555_v26, %v2554_v41 }
 0x42d   :  { %v2147_v55 = vadd.f32 %v2556_v42, %v2284_v34  ;;  %v2557_v51 = vpop.f32.mrb[38].mxu0 }
 0x42e   :  { %v2558_v21 = vpop.f32.mrb[39].mxu0 }
 0x42f   :  { %v2559_v10 = vadd.f32 %v2558_v21, %v2557_v51  ;;  %v2222_v17 = vadd.f32 %v2594_v24, %v2147_v55 }
 0x431   :  { %v2152_v40 = vadd.f32 %v2559_v10, %v2284_v34  ;;  %v2230_v53 = vmul.f32 %v2222_v17, %v2005_v5 }
 0x433   :  { %2232 = vadd.xlane.f32.xlu0 %v2230_v53  ;;  %v2227_v48 = vadd.f32 %v2597_v0, %v2152_v40 }
 0x435   :  { %v2231_v2 = vmul.f32 %v2227_v48, %v2006_v25 }
 0x437   :  { %2234 = vadd.xlane.f32.xlu1 %v2231_v2 }
 0x4ad   :  { %v1986_v56 = vpop.xlane.xlu1 %1985 }
 0x4ae   :  { %v1486_v57 = vpop.xlane.xlu0 %1485 }
 0x4b2   :  { %v1488_v30 = vpop.xlane.xlu1 %1487 }
 0x4b3   :  { %v1735_v19 = vpop.xlane.xlu0 %1734 }
 0x4b4   :  { %v2237_v23 = vsel %vm2236_vm3, %v1486_v57, %v1735_v19 }
 0x4b6   :  { %v1737_v43 = vpop.xlane.xlu1 %1736 }
 0x4b7   :  { %v1984_v58 = vpop.xlane.xlu0 %1983  ;;  %v2238_v63 = vsel %vm2236_vm3, %v1488_v30, %v1737_v43 }
 0x4b8   :  { %v2240_v59 = vsel %vm2239_vm4, %v2237_v23, %v1984_v58  ;;  %v2241_v46 = vsel %vm2239_vm4, %v2238_v63, %v1986_v56 }
 0x4c0   :  { %v2233_v62 = vpop.xlane.xlu0 %2232 }
 0x4c1   :  { %v2243_v60 = vsel %vm2242_vm5, %v2240_v59, %v2233_v62 }
 0x4c2   :  { %2246 = vst.msk [vmem:[%s3544_s11] sm:$0xff] %vm2245_vm6, %v2243_v60 }
 0x4c4   :  { %v2235_v15 = vpop.xlane.xlu1 %2234 }
 0x4c5   :  { %v2244_v50 = vsel %vm2242_vm5, %v2241_v46, %v2235_v15 }
 0x4c6   :  { %2247 = vst.msk [vmem:[%s3544_s11 + $0x8] sm:$0xff] %vm2245_vm6, %v2244_v50 }
 0x4c7   :  { %2252 = vsyncpa [#allocation3], 1 }
 0x4c8   :  { %2253 = vsyncpa [#allocation5], 1 }
 0x4c9   :  { %2254 = vsyncpa [#allocation8], 1 }

</bundles_post_ra>
